<compile_context>
chip_gen: v5e
topology: v5e:2x2
jax: 0.10.0
libtpu: 0.0.40
codegen_flags: <defaults>
</compile_context>

<pallas_src>
import functools
import math

import jax
import jax.numpy as jnp
import numpy as np
from jax.experimental import pallas as pl
from jax.experimental.pallas import tpu as pltpu


# ----------------------------------------------------------------------------
# Pallas kernel
# ----------------------------------------------------------------------------
def _ray_bending_style_nerf_kernel(
    bbox_ref,       # (2, 3) VMEM: row 0 = lower bounds, row 1 = upper bounds
    pos_ref,        # (TM, 3)      per-position rows of this tile
    rin_ref,        # (Rt, Cr)     per-ray rows: [orig(3)|dir(3)|style(S)|deform(D)]
    exp_ref,        # (TM, Rt)     0/1 ray->row expansion matrix
    wb_pos_ref,     # (3, H)       ray bender, position branch
    wb_def_ref,     # (D, H)       ray bender, deformation branch
    bb1_ref,        # (1, H)
    wb_out_ref,     # (H, 3)
    bb2_ref,        # (1, 3)
    wn_pos_ref,     # (3, H)       nerf, bent-position branch
    wn_ray_ref,     # (3+3+S, H)   nerf, fused [orig|dir|style] branch
    bn1_ref,        # (1, H)
    wn_head_ref,    # (H, F+1)     fused [features|alpha] head
    bn_head_ref,    # (1, F+1)
    out_ref,        # (TM, F+1+3+3) packed output: [feat(F)|alpha(1)|disp(3)|bent(3)]
    *,
    empty_space_alpha: float,
    canonical_pose: bool,
):
    f32 = jnp.float32
    pos = pos_ref[...]                          # (TM, 3)
    rin = rin_ref[...]                          # (Rt, Cr)
    exp_mat = exp_ref[...]                      # (TM, Rt)

    c_ray_nerf = wn_ray_ref.shape[0]            # 3 + 3 + S
    F = wn_head_ref.shape[1] - 1

    # ---- bounding box mask (vectorized compare + lane reduce) ---------------
    lo = bbox_ref[0:1, :]                       # (1, 3)
    hi = bbox_ref[1:2, :]                       # (1, 3)
    inb = jnp.logical_and(pos >= lo, pos <= hi).astype(f32)      # (TM, 3)
    mask = jnp.sum(inb, axis=-1, keepdims=True) > 2.5            # (TM, 1) bool

    # ---- per-ray first-layer contributions, expanded to rows via MXU --------
    ray_nerf_in = rin[:, :c_ray_nerf]                             # (Rt, 3+3+S)
    hn_ray = jnp.dot(ray_nerf_in, wn_ray_ref[...],
                     preferred_element_type=f32)                  # (Rt, H)
    hn = jnp.dot(exp_mat, hn_ray, preferred_element_type=f32)     # (TM, H)

    # ---- ray bender: MLP(pos, deformation) -> displacement ------------------
    if canonical_pose:
        disp = jnp.zeros_like(pos)
        bent = pos
    else:
        deform = rin[:, c_ray_nerf:]                              # (Rt, D)
        hb_ray = jnp.dot(deform, wb_def_ref[...],
                         preferred_element_type=f32)              # (Rt, H)
        hb = jnp.dot(exp_mat, hb_ray, preferred_element_type=f32) # (TM, H)
        h = jnp.maximum(
            jnp.dot(pos, wb_pos_ref[...], preferred_element_type=f32)
            + hb + bb1_ref[...], 0.0)                             # (TM, H)
        disp = jnp.dot(h, wb_out_ref[...],
                       preferred_element_type=f32) + bb2_ref[...] # (TM, 3)
        bent = pos + disp

    # ---- nerf model: MLP(bent_pos, origins, directions, style) --------------
    h2 = jnp.maximum(
        jnp.dot(bent, wn_pos_ref[...], preferred_element_type=f32)
        + hn + bn1_ref[...], 0.0)                                 # (TM, H)
    head = jnp.dot(h2, wn_head_ref[...],
                   preferred_element_type=f32) + bn_head_ref[...] # (TM, F+1)

    # ---- masked scatter into the packed output slab --------------------------
    # fill row: 0 for features, empty_space_alpha for the alpha column
    col = jax.lax.broadcasted_iota(jnp.int32, (1, F + 1), 1)
    head_fill = jnp.where(col == F, f32(empty_space_alpha), f32(0.0))

    out_ref[:, 0:F + 1] = jnp.where(mask, head, head_fill)
    out_ref[:, F + 1:F + 4] = jnp.where(mask, disp, 0.0)
    out_ref[:, F + 4:F + 7] = jnp.where(mask, bent, 0.0)


# ----------------------------------------------------------------------------
# Wrapper
# ----------------------------------------------------------------------------
def ray_bending_style_nerf_forward(
    params,
    bounding_box,            # (3, 2) float32
    ray_positions,           # (..., P, 3)
    ray_origins,             # (..., 3)
    ray_directions,          # (..., 3)
    style,                   # (..., S)
    deformation,             # (..., D)
    empty_space_alpha: float,
    canonical_pose: bool = False,
    tile_rows: int = 2048,
):
    f32 = jnp.float32
    P = ray_positions.shape[-2]
    batch_shape = ray_positions.shape[:-2]
    R = math.prod(batch_shape) if batch_shape else 1
    S = style.shape[-1]
    D = deformation.shape[-1]
    H = params["wb_pos"].shape[-1]
    F = params["wn_feat"].shape[-1]
    Cr = 3 + 3 + S + D
    Cout = F + 1 + 3 + 3

    # ---- ray-tile sizing: row tile = tile_r * P ------------------------------
    tile_r = max(1, tile_rows // P)
    if R >= 2:
        tile_r = min(tile_r, (R + 1) // 2)   # keep >= 2 grid steps for megacore (v7x)
    tile_r = -(-tile_r // 8) * 8             # sublane alignment for all blocks
    R_pad = -(-R // tile_r) * tile_r         # remainder handled by ray padding
    grid_len = R_pad // tile_r
    TM = tile_r * P

    # ---- inputs: positions per-row, everything else per-ray (no P-fold HBM
    #      broadcast of origins / directions / style / deformation) ------------
    pos = ray_positions.reshape(R, P, 3).astype(f32)
    rin = jnp.concatenate(
        [
            ray_origins.reshape(R, 3).astype(f32),
            ray_directions.reshape(R, 3).astype(f32),
            style.reshape(R, S).astype(f32),
            deformation.reshape(R, D).astype(f32),
        ],
        axis=-1,
    )
    if R_pad != R:
        pos = jnp.concatenate([pos, jnp.zeros((R_pad - R, P, 3), f32)], axis=0)
        rin = jnp.concatenate([rin, jnp.zeros((R_pad - R, Cr), f32)], axis=0)
    flat_pos = pos.reshape(R_pad * P, 3)

    # ray -> row expansion matrix (constant block index => DMA'd once, resident)
    row_ids = jnp.arange(TM, dtype=jnp.int32)[:, None]
    col_ids = jnp.arange(tile_r, dtype=jnp.int32)[None, :]
    exp_mat = ((row_ids // P) == col_ids).astype(f32)             # (TM, tile_r)

    # fused weights
    wn_ray = jnp.concatenate(
        [params["wn_orig"], params["wn_dir"], params["wn_style"]], axis=0
    ).astype(f32)                                                  # (3+3+S, H)
    wn_head = jnp.concatenate([params["wn_feat"], params["wn_alpha"]], axis=1).astype(f32)
    bn_head = jnp.concatenate([params["bn_feat"], params["bn_alpha"]], axis=1).astype(f32)

    bbox = jnp.stack(
        [bounding_box[:, 0], bounding_box[:, 1]], axis=0
    ).astype(f32)                                                  # (2, 3)

    kernel = functools.partial(
        _ray_bending_style_nerf_kernel,
        empty_space_alpha=float(empty_space_alpha),
        canonical_pose=bool(canonical_pose),
    )

    def full_spec(shape):
        return pl.BlockSpec(shape, lambda i, _s=shape: (0,) * len(_s))

    in_specs = [
        full_spec((2, 3)),                                  # bbox
        pl.BlockSpec((TM, 3), lambda i: (i, 0)),            # positions
        pl.BlockSpec((tile_r, Cr), lambda i: (i, 0)),       # per-ray inputs
        full_spec((TM, tile_r)),                            # expansion matrix
        full_spec((3, H)),                                  # wb_pos
        full_spec((D, H)),                                  # wb_def
        full_spec((1, H)),                                  # bb1
        full_spec((H, 3)),                                  # wb_out
        full_spec((1, 3)),                                  # bb2
        full_spec((3, H)),                                  # wn_pos
        full_spec((3 + 3 + S, H)),                          # wn_ray (fused)
        full_spec((1, H)),                                  # bn1
        full_spec((H, F + 1)),                              # wn_head (fused)
        full_spec((1, F + 1)),                              # bn_head (fused)
    ]
    out_specs = pl.BlockSpec((TM, Cout), lambda i: (i, 0))

    packed = pl.pallas_call(
        kernel,
        out_shape=jax.ShapeDtypeStruct((R_pad * P, Cout), f32),
        grid_spec=pltpu.PrefetchScalarGridSpec(
            num_scalar_prefetch=0,
            grid=(grid_len,),
            in_specs=in_specs,
            out_specs=out_specs,
        ),
        compiler_params=pltpu.CompilerParams(
            dimension_semantics=("parallel",),
        ),
    )(
        bbox, flat_pos, rin, exp_mat,
        params["wb_pos"].astype(f32), params["wb_def"].astype(f32),
        params["bb1"].astype(f32), params["wb_out"].astype(f32),
        params["bb2"].astype(f32),
        params["wn_pos"].astype(f32), wn_ray, params["bn1"].astype(f32),
        wn_head, bn_head,
    )

    # drop padded rays, unpack the output slab, fold back to (..., P, C)
    N = R * P
    packed = packed[:N]
    prefix = batch_shape + (P,)
    output_features = packed[:, :F].reshape(prefix + (F,))
    output_alphas = packed[:, F].reshape(prefix)
    output_ray_displacements = packed[:, F + 1:F + 4].reshape(prefix + (3,))
    extra_outputs = {
        "bent_ray_positions": packed[:, F + 4:F + 7].reshape(prefix + (3,)),
    }
    return output_features, output_alphas, output_ray_displacements, extra_outputs


# ----------------------------------------------------------------------------
# Pure-JAX reference (same masked-select semantics as the PyTorch gather/scatter)
# ----------------------------------------------------------------------------
def ray_bending_style_nerf_reference(
    params, bounding_box, ray_positions, ray_origins, ray_directions,
    style, deformation, empty_space_alpha, canonical_pose=False,
):
    hp = jax.lax.Precision.HIGHEST
    dot = lambda a, b: jnp.dot(a, b, precision=hp)
    f32 = jnp.float32
    P = ray_positions.shape[-2]
    batch_shape = ray_positions.shape[:-2]

    def expand(x):
        return jnp.broadcast_to(x[..., None, :], batch_shape + (P, x.shape[-1]))

    pos = ray_positions.reshape(-1, 3).astype(f32)
    orig = expand(ray_origins).reshape(-1, 3).astype(f32)
    dirs = expand(ray_directions).reshape(-1, 3).astype(f32)
    sty = expand(style).reshape(-1, style.shape[-1]).astype(f32)
    de = expand(deformation).reshape(-1, deformation.shape[-1]).astype(f32)

    mask = jnp.all(
        jnp.logical_and(pos >= bounding_box[:, 0], pos <= bounding_box[:, 1]),
        axis=-1, keepdims=True)

    h = jnp.maximum(dot(pos, params["wb_pos"]) + dot(de, params["wb_def"])
                    + params["bb1"], 0.0)
    disp = dot(h, params["wb_out"]) + params["bb2"]
    if canonical_pose:
        disp = disp * 0.0
    bent = pos + disp
    h2 = jnp.maximum(dot(bent, params["wn_pos"]) + dot(dirs, params["wn_dir"])
                     + dot(orig, params["wn_orig"]) + dot(sty, params["wn_style"])
                     + params["bn1"], 0.0)
    feats = dot(h2, params["wn_feat"]) + params["bn_feat"]
    alpha = dot(h2, params["wn_alpha"]) + params["bn_alpha"]

    feats = jnp.where(mask, feats, 0.0)
    alpha = jnp.where(mask, alpha, empty_space_alpha)
    disp = jnp.where(mask, disp, 0.0)
    bent = jnp.where(mask, bent, 0.0)

    F = params["wn_feat"].shape[-1]
    prefix = batch_shape + (P,)
    return (feats.reshape(prefix + (F,)),
            alpha[:, 0].reshape(prefix),
            disp.reshape(prefix + (3,)),
            {"bent_ray_positions": bent.reshape(prefix + (3,))})


# ----------------------------------------------------------------------------
# Deterministic synthetic parameter init (stands in for config-built submodels)
# ----------------------------------------------------------------------------
def make_params(key, style_features, deformation_features, hidden, out_features):
    ks = jax.random.split(key, 16)

    def w(k, shape, scale=0.1):
        return (scale * jax.random.normal(k, shape)).astype(jnp.float32)

    return {
        # ray bender MLP
        "wb_pos": w(ks[0], (3, hidden)),
        "wb_def": w(ks[1], (deformation_features, hidden)),
        "bb1": w(ks[2], (1, hidden)),
        "wb_out": w(ks[3], (hidden, 3), scale=0.05),
        "bb2": w(ks[4], (1, 3), scale=0.05),
        # nerf MLP
        "wn_pos": w(ks[5], (3, hidden)),
        "wn_dir": w(ks[6], (3, hidden)),
        "wn_orig": w(ks[7], (3, hidden)),
        "wn_style": w(ks[8], (style_features, hidden)),
        "bn1": w(ks[9], (1, hidden)),
        "wn_feat": w(ks[10], (hidden, out_features)),
        "bn_feat": w(ks[11], (1, out_features)),
        "wn_alpha": w(ks[12], (hidden, 1)),
        "bn_alpha": w(ks[13], (1, 1)),
    }


if __name__ == "__main__":
    key = jax.random.PRNGKey(0)
    k_param, k_pos, k_orig, k_dir, k_sty, k_def = jax.random.split(key, 6)

    batch = (2, 8)
    P = 16
    style_features = 4
    deformation_features = 4
    hidden = 32
    out_features = 8
    empty_space_alpha = -1e5

    ray_positions = jax.random.normal(k_pos, batch + (P, 3), dtype=jnp.float32)
    ray_origins = jax.random.normal(k_orig, batch + (3,), dtype=jnp.float32)
    ray_directions = jax.random.normal(k_dir, batch + (3,), dtype=jnp.float32)
    style = jax.random.normal(k_sty, batch + (style_features,), dtype=jnp.float32)
    deformation = jax.random.normal(
        k_def, batch + (deformation_features,), dtype=jnp.float32)

    bounding_box = jnp.array(
        [[-1.0, 1.0], [-1.0, 1.0], [-1.0, 1.0]], dtype=jnp.float32)

    params = make_params(
        k_param, style_features, deformation_features, hidden, out_features)

    feats, alphas, disps, extras = ray_bending_style_nerf_forward(
        params, bounding_box, ray_positions, ray_origins, ray_directions,
        style, deformation, empty_space_alpha=empty_space_alpha,
        canonical_pose=False)
    jax.block_until_ready((feats, alphas, disps, extras))

    assert feats.shape == batch + (P, out_features)
    assert alphas.shape == batch + (P,)
    assert disps.shape == batch + (P, 3)
    assert extras["bent_ray_positions"].shape == batch + (P, 3)

    # correctness check against the pure-JAX reference
    r_feats, r_alphas, r_disps, r_extras = ray_bending_style_nerf_reference(
        params, bounding_box, ray_positions, ray_origins, ray_directions,
        style, deformation, empty_space_alpha=empty_space_alpha,
        canonical_pose=False)
    np.testing.assert_allclose(np.asarray(feats), np.asarray(r_feats), rtol=2e-2, atol=2e-2)
    np.testing.assert_allclose(np.asarray(alphas), np.asarray(r_alphas), rtol=2e-2, atol=2e-2)
    np.testing.assert_allclose(np.asarray(disps), np.asarray(r_disps), rtol=2e-2, atol=2e-2)
    np.testing.assert_allclose(np.asarray(extras["bent_ray_positions"]),
                               np.asarray(r_extras["bent_ray_positions"]),
                               rtol=2e-2, atol=2e-2)

    print("KERNEL_OK")
</pallas_src>

<mosaic_0001>
module attributes {stable_mosaic.version = 11 : i64} {
  func.func @_ray_bending_style_nerf_kernel(%arg0: i32, %arg1: memref<2x3xf32, #tpu.memory_space<vmem>>, %arg2: memref<128x3xf32, #tpu.memory_space<vmem>>, %arg3: memref<8x14xf32, #tpu.memory_space<vmem>>, %arg4: memref<128x8xf32, #tpu.memory_space<vmem>>, %arg5: memref<3x32xf32, #tpu.memory_space<vmem>>, %arg6: memref<4x32xf32, #tpu.memory_space<vmem>>, %arg7: memref<1x32xf32, #tpu.memory_space<vmem>>, %arg8: memref<32x3xf32, #tpu.memory_space<vmem>>, %arg9: memref<1x3xf32, #tpu.memory_space<vmem>>, %arg10: memref<3x32xf32, #tpu.memory_space<vmem>>, %arg11: memref<10x32xf32, #tpu.memory_space<vmem>>, %arg12: memref<1x32xf32, #tpu.memory_space<vmem>>, %arg13: memref<32x9xf32, #tpu.memory_space<vmem>>, %arg14: memref<1x9xf32, #tpu.memory_space<vmem>>, %arg15: memref<128x15xf32, #tpu.memory_space<vmem>>) attributes {dimension_semantics = [#tpu.dimension_semantics<parallel>], iteration_bounds = array<i64: 2>, scalar_prefetch = 0 : i64, scratch_operands = 0 : i64, tpu.core_type = #tpu.core_type<tc>, window_params = [{pipeline_mode = #tpu.pipeline_mode<synchronous>, transform_indices = @transform_0, window_bounds = array<i64: 2, 3>}, {transform_indices = @transform_1, window_bounds = array<i64: 128, 3>}, {transform_indices = @transform_2, window_bounds = array<i64: 8, 14>}, {pipeline_mode = #tpu.pipeline_mode<synchronous>, transform_indices = @transform_3, window_bounds = array<i64: 128, 8>}, {pipeline_mode = #tpu.pipeline_mode<synchronous>, transform_indices = @transform_4, window_bounds = array<i64: 3, 32>}, {pipeline_mode = #tpu.pipeline_mode<synchronous>, transform_indices = @transform_5, window_bounds = array<i64: 4, 32>}, {pipeline_mode = #tpu.pipeline_mode<synchronous>, transform_indices = @transform_6, window_bounds = array<i64: 1, 32>}, {pipeline_mode = #tpu.pipeline_mode<synchronous>, transform_indices = @transform_7, window_bounds = array<i64: 32, 3>}, {pipeline_mode = #tpu.pipeline_mode<synchronous>, transform_indices = @transform_8, window_bounds = array<i64: 1, 3>}, {pipeline_mode = #tpu.pipeline_mode<synchronous>, transform_indices = @transform_9, window_bounds = array<i64: 3, 32>}, {pipeline_mode = #tpu.pipeline_mode<synchronous>, transform_indices = @transform_10, window_bounds = array<i64: 10, 32>}, {pipeline_mode = #tpu.pipeline_mode<synchronous>, transform_indices = @transform_11, window_bounds = array<i64: 1, 32>}, {pipeline_mode = #tpu.pipeline_mode<synchronous>, transform_indices = @transform_12, window_bounds = array<i64: 32, 9>}, {pipeline_mode = #tpu.pipeline_mode<synchronous>, transform_indices = @transform_13, window_bounds = array<i64: 1, 9>}, {transform_indices = @transform_14, window_bounds = array<i64: 128, 15>}]} {
    %c0 = arith.constant 0 : index
    %c0_0 = arith.constant 0 : index
    %0 = vector.load %arg2[%c0, %c0_0] : memref<128x3xf32, #tpu.memory_space<vmem>>, vector<128x3xf32>
    %c0_1 = arith.constant 0 : index
    %c0_2 = arith.constant 0 : index
    %1 = vector.load %arg3[%c0_1, %c0_2] : memref<8x14xf32, #tpu.memory_space<vmem>>, vector<8x14xf32>
    %c0_3 = arith.constant 0 : index
    %c0_4 = arith.constant 0 : index
    %2 = vector.load %arg4[%c0_3, %c0_4] : memref<128x8xf32, #tpu.memory_space<vmem>>, vector<128x8xf32>
    %c0_5 = arith.constant 0 : index
    %c0_6 = arith.constant 0 : index
    %3 = vector.load %arg1[%c0_5, %c0_6] : memref<2x3xf32, #tpu.memory_space<vmem>>, vector<1x3xf32>
    %c1 = arith.constant 1 : index
    %c0_7 = arith.constant 0 : index
    %4 = vector.load %arg1[%c1, %c0_7] : memref<2x3xf32, #tpu.memory_space<vmem>>, vector<1x3xf32>
    %5 = vector.broadcast %3 : vector<1x3xf32> to vector<128x3xf32>
    %6 = arith.cmpf oge, %0, %5 : vector<128x3xf32>
    %7 = vector.broadcast %4 : vector<1x3xf32> to vector<128x3xf32>
    %8 = arith.cmpf ole, %0, %7 : vector<128x3xf32>
    %9 = arith.andi %6, %8 : vector<128x3xi1>
    %10 = arith.extui %9 : vector<128x3xi1> to vector<128x3xi32>
    %11 = arith.sitofp %10 : vector<128x3xi32> to vector<128x3xf32>
    %cst = arith.constant dense<0.000000e+00> : vector<128xf32>
    %12 = vector.multi_reduction <add>, %11, %cst [1] : vector<128x3xf32> to vector<128xf32>
    %13 = vector.shape_cast %12 : vector<128xf32> to vector<128x1xf32>
    %cst_8 = arith.constant 2.500000e+00 : f32
    %14 = vector.broadcast %cst_8 : f32 to vector<128x1xf32>
    %15 = arith.cmpf ogt, %13, %14 : vector<128x1xf32>
    %16 = vector.extract_strided_slice %1 {offsets = [0, 0], sizes = [8, 10], strides = [1, 1]} : vector<8x14xf32> to vector<8x10xf32>
    %c0_9 = arith.constant 0 : index
    %c0_10 = arith.constant 0 : index
    %17 = vector.load %arg11[%c0_9, %c0_10] : memref<10x32xf32, #tpu.memory_space<vmem>>, vector<10x32xf32>
    %cst_11 = arith.constant dense<0.000000e+00> : vector<8x32xf32>
    %18 = tpu.matmul %16, %17, %cst_11 {dimension_numbers = #tpu.dot_dimension_numbers<[1], [0], [0], [1], [0, 0, 1, 1], [], []>} : vector<8x10xf32>, vector<10x32xf32>, vector<8x32xf32> -> vector<8x32xf32>
    %cst_12 = arith.constant dense<0.000000e+00> : vector<128x32xf32>
    %19 = tpu.matmul %2, %18, %cst_12 {dimension_numbers = #tpu.dot_dimension_numbers<[1], [0], [0], [1], [0, 0, 1, 1], [], []>} : vector<128x8xf32>, vector<8x32xf32>, vector<128x32xf32> -> vector<128x32xf32>
    %20 = vector.extract_strided_slice %1 {offsets = [0, 10], sizes = [8, 4], strides = [1, 1]} : vector<8x14xf32> to vector<8x4xf32>
    %c0_13 = arith.constant 0 : index
    %c0_14 = arith.constant 0 : index
    %21 = vector.load %arg6[%c0_13, %c0_14] : memref<4x32xf32, #tpu.memory_space<vmem>>, vector<4x32xf32>
    %cst_15 = arith.constant dense<0.000000e+00> : vector<8x32xf32>
    %22 = tpu.matmul %20, %21, %cst_15 {dimension_numbers = #tpu.dot_dimension_numbers<[1], [0], [0], [1], [0, 0, 1, 1], [], []>} : vector<8x4xf32>, vector<4x32xf32>, vector<8x32xf32> -> vector<8x32xf32>
    %cst_16 = arith.constant dense<0.000000e+00> : vector<128x32xf32>
    %23 = tpu.matmul %2, %22, %cst_16 {dimension_numbers = #tpu.dot_dimension_numbers<[1], [0], [0], [1], [0, 0, 1, 1], [], []>} : vector<128x8xf32>, vector<8x32xf32>, vector<128x32xf32> -> vector<128x32xf32>
    %c0_17 = arith.constant 0 : index
    %c0_18 = arith.constant 0 : index
    %24 = vector.load %arg5[%c0_17, %c0_18] : memref<3x32xf32, #tpu.memory_space<vmem>>, vector<3x32xf32>
    %cst_19 = arith.constant dense<0.000000e+00> : vector<128x32xf32>
    %25 = tpu.matmul %0, %24, %cst_19 {dimension_numbers = #tpu.dot_dimension_numbers<[1], [0], [0], [1], [0, 0, 1, 1], [], []>} : vector<128x3xf32>, vector<3x32xf32>, vector<128x32xf32> -> vector<128x32xf32>
    %26 = arith.addf %25, %23 : vector<128x32xf32>
    %c0_20 = arith.constant 0 : index
    %c0_21 = arith.constant 0 : index
    %27 = vector.load %arg7[%c0_20, %c0_21] : memref<1x32xf32, #tpu.memory_space<vmem>>, vector<1x32xf32>
    %28 = vector.broadcast %27 : vector<1x32xf32> to vector<128x32xf32>
    %29 = arith.addf %26, %28 : vector<128x32xf32>
    %cst_22 = arith.constant 0.000000e+00 : f32
    %30 = vector.broadcast %cst_22 : f32 to vector<128x32xf32>
    %31 = arith.maximumf %29, %30 : vector<128x32xf32>
    %c0_23 = arith.constant 0 : index
    %c0_24 = arith.constant 0 : index
    %32 = vector.load %arg8[%c0_23, %c0_24] : memref<32x3xf32, #tpu.memory_space<vmem>>, vector<32x3xf32>
    %cst_25 = arith.constant dense<0.000000e+00> : vector<128x3xf32>
    %33 = tpu.matmul %31, %32, %cst_25 {dimension_numbers = #tpu.dot_dimension_numbers<[1], [0], [0], [1], [0, 0, 1, 1], [], []>} : vector<128x32xf32>, vector<32x3xf32>, vector<128x3xf32> -> vector<128x3xf32>
    %c0_26 = arith.constant 0 : index
    %c0_27 = arith.constant 0 : index
    %34 = vector.load %arg9[%c0_26, %c0_27] : memref<1x3xf32, #tpu.memory_space<vmem>>, vector<1x3xf32>
    %35 = vector.broadcast %34 : vector<1x3xf32> to vector<128x3xf32>
    %36 = arith.addf %33, %35 : vector<128x3xf32>
    %37 = arith.addf %0, %36 : vector<128x3xf32>
    %c0_28 = arith.constant 0 : index
    %c0_29 = arith.constant 0 : index
    %38 = vector.load %arg10[%c0_28, %c0_29] : memref<3x32xf32, #tpu.memory_space<vmem>>, vector<3x32xf32>
    %cst_30 = arith.constant dense<0.000000e+00> : vector<128x32xf32>
    %39 = tpu.matmul %37, %38, %cst_30 {dimension_numbers = #tpu.dot_dimension_numbers<[1], [0], [0], [1], [0, 0, 1, 1], [], []>} : vector<128x3xf32>, vector<3x32xf32>, vector<128x32xf32> -> vector<128x32xf32>
    %40 = arith.addf %39, %19 : vector<128x32xf32>
    %c0_31 = arith.constant 0 : index
    %c0_32 = arith.constant 0 : index
    %41 = vector.load %arg12[%c0_31, %c0_32] : memref<1x32xf32, #tpu.memory_space<vmem>>, vector<1x32xf32>
    %42 = vector.broadcast %41 : vector<1x32xf32> to vector<128x32xf32>
    %43 = arith.addf %40, %42 : vector<128x32xf32>
    %cst_33 = arith.constant 0.000000e+00 : f32
    %44 = vector.broadcast %cst_33 : f32 to vector<128x32xf32>
    %45 = arith.maximumf %43, %44 : vector<128x32xf32>
    %c0_34 = arith.constant 0 : index
    %c0_35 = arith.constant 0 : index
    %46 = vector.load %arg13[%c0_34, %c0_35] : memref<32x9xf32, #tpu.memory_space<vmem>>, vector<32x9xf32>
    %cst_36 = arith.constant dense<0.000000e+00> : vector<128x9xf32>
    %47 = tpu.matmul %45, %46, %cst_36 {dimension_numbers = #tpu.dot_dimension_numbers<[1], [0], [0], [1], [0, 0, 1, 1], [], []>} : vector<128x32xf32>, vector<32x9xf32>, vector<128x9xf32> -> vector<128x9xf32>
    %c0_37 = arith.constant 0 : index
    %c0_38 = arith.constant 0 : index
    %48 = vector.load %arg14[%c0_37, %c0_38] : memref<1x9xf32, #tpu.memory_space<vmem>>, vector<1x9xf32>
    %49 = vector.broadcast %48 : vector<1x9xf32> to vector<128x9xf32>
    %50 = arith.addf %47, %49 : vector<128x9xf32>
    %51 = tpu.iota {dimensions = array<i32: 1>} : vector<1x9xi32>
    %c8_i32 = arith.constant 8 : i32
    %52 = vector.broadcast %c8_i32 : i32 to vector<1x9xi32>
    %53 = arith.cmpi eq, %51, %52 : vector<1x9xi32>
    %cst_39 = arith.constant -1.000000e+05 : f32
    %cst_40 = arith.constant 0.000000e+00 : f32
    %54 = vector.broadcast %cst_39 : f32 to vector<1x9xf32>
    %55 = vector.broadcast %cst_40 : f32 to vector<1x9xf32>
    %56 = arith.select %53, %54, %55 : vector<1x9xi1>, vector<1x9xf32>
    %57 = vector.shape_cast %15 : vector<128x1xi1> to vector<128x1xi1>
    %58 = vector.broadcast %57 : vector<128x1xi1> to vector<128x9xi1>
    %59 = vector.shape_cast %56 : vector<1x9xf32> to vector<1x9xf32>
    %60 = vector.broadcast %59 : vector<1x9xf32> to vector<128x9xf32>
    %61 = arith.select %58, %50, %60 : vector<128x9xi1>, vector<128x9xf32>
    %c0_41 = arith.constant 0 : index
    %c0_42 = arith.constant 0 : index
    %62 = vector.load %arg15[%c0_41, %c0_42] : memref<128x15xf32, #tpu.memory_space<vmem>>, vector<128x9xf32>
    tpu.vector_store %arg15[%c0_41, %c0_42], %61 {strides = array<i32>} : memref<128x15xf32, #tpu.memory_space<vmem>>, vector<128x9xf32>,
    %cst_43 = arith.constant 0.000000e+00 : f32
    %63 = vector.shape_cast %15 : vector<128x1xi1> to vector<128x1xi1>
    %64 = vector.broadcast %63 : vector<128x1xi1> to vector<128x3xi1>
    %65 = vector.broadcast %cst_43 : f32 to vector<128x3xf32>
    %66 = arith.select %64, %36, %65 : vector<128x3xi1>, vector<128x3xf32>
    %c0_44 = arith.constant 0 : index
    %c9 = arith.constant 9 : index
    %67 = vector.load %arg15[%c0_44, %c9] : memref<128x15xf32, #tpu.memory_space<vmem>>, vector<128x3xf32>
    tpu.vector_store %arg15[%c0_44, %c9], %66 {strides = array<i32>} : memref<128x15xf32, #tpu.memory_space<vmem>>, vector<128x3xf32>,
    %cst_45 = arith.constant 0.000000e+00 : f32
    %68 = vector.shape_cast %15 : vector<128x1xi1> to vector<128x1xi1>
    %69 = vector.broadcast %68 : vector<128x1xi1> to vector<128x3xi1>
    %70 = vector.broadcast %cst_45 : f32 to vector<128x3xf32>
    %71 = arith.select %69, %37, %70 : vector<128x3xi1>, vector<128x3xf32>
    %c0_46 = arith.constant 0 : index
    %c12 = arith.constant 12 : index
    %72 = vector.load %arg15[%c0_46, %c12] : memref<128x15xf32, #tpu.memory_space<vmem>>, vector<128x3xf32>
    tpu.vector_store %arg15[%c0_46, %c12], %71 {strides = array<i32>} : memref<128x15xf32, #tpu.memory_space<vmem>>, vector<128x3xf32>,
    return
  }
  func.func @transform_0(%arg0: i32) -> (i32, i32) {
    %c0_i32 = arith.constant 0 : i32
    %c0_i32_0 = arith.constant 0 : i32
    %c0_i32_1 = arith.constant 0 : i32
    return %c0_i32, %c0_i32_0 : i32, i32
  }
  func.func @transform_1(%arg0: i32) -> (i32, i32) {
    %c0_i32 = arith.constant 0 : i32
    %c0_i32_0 = arith.constant 0 : i32
    return %arg0, %c0_i32 : i32, i32
  }
  func.func @transform_2(%arg0: i32) -> (i32, i32) {
    %c0_i32 = arith.constant 0 : i32
    %c0_i32_0 = arith.constant 0 : i32
    return %arg0, %c0_i32 : i32, i32
  }
  func.func @transform_3(%arg0: i32) -> (i32, i32) {
    %c0_i32 = arith.constant 0 : i32
    %c0_i32_0 = arith.constant 0 : i32
    %c0_i32_1 = arith.constant 0 : i32
    return %c0_i32, %c0_i32_0 : i32, i32
  }
  func.func @transform_4(%arg0: i32) -> (i32, i32) {
    %c0_i32 = arith.constant 0 : i32
    %c0_i32_0 = arith.constant 0 : i32
    %c0_i32_1 = arith.constant 0 : i32
    return %c0_i32, %c0_i32_0 : i32, i32
  }
  func.func @transform_5(%arg0: i32) -> (i32, i32) {
    %c0_i32 = arith.constant 0 : i32
    %c0_i32_0 = arith.constant 0 : i32
    %c0_i32_1 = arith.constant 0 : i32
    return %c0_i32, %c0_i32_0 : i32, i32
  }
  func.func @transform_6(%arg0: i32) -> (i32, i32) {
    %c0_i32 = arith.constant 0 : i32
    %c0_i32_0 = arith.constant 0 : i32
    %c0_i32_1 = arith.constant 0 : i32
    return %c0_i32, %c0_i32_0 : i32, i32
  }
  func.func @transform_7(%arg0: i32) -> (i32, i32) {
    %c0_i32 = arith.constant 0 : i32
    %c0_i32_0 = arith.constant 0 : i32
    %c0_i32_1 = arith.constant 0 : i32
    return %c0_i32, %c0_i32_0 : i32, i32
  }
  func.func @transform_8(%arg0: i32) -> (i32, i32) {
    %c0_i32 = arith.constant 0 : i32
    %c0_i32_0 = arith.constant 0 : i32
    %c0_i32_1 = arith.constant 0 : i32
    return %c0_i32, %c0_i32_0 : i32, i32
  }
  func.func @transform_9(%arg0: i32) -> (i32, i32) {
    %c0_i32 = arith.constant 0 : i32
    %c0_i32_0 = arith.constant 0 : i32
    %c0_i32_1 = arith.constant 0 : i32
    return %c0_i32, %c0_i32_0 : i32, i32
  }
  func.func @transform_10(%arg0: i32) -> (i32, i32) {
    %c0_i32 = arith.constant 0 : i32
    %c0_i32_0 = arith.constant 0 : i32
    %c0_i32_1 = arith.constant 0 : i32
    return %c0_i32, %c0_i32_0 : i32, i32
  }
  func.func @transform_11(%arg0: i32) -> (i32, i32) {
    %c0_i32 = arith.constant 0 : i32
    %c0_i32_0 = arith.constant 0 : i32
    %c0_i32_1 = arith.constant 0 : i32
    return %c0_i32, %c0_i32_0 : i32, i32
  }
  func.func @transform_12(%arg0: i32) -> (i32, i32) {
    %c0_i32 = arith.constant 0 : i32
    %c0_i32_0 = arith.constant 0 : i32
    %c0_i32_1 = arith.constant 0 : i32
    return %c0_i32, %c0_i32_0 : i32, i32
  }
  func.func @transform_13(%arg0: i32) -> (i32, i32) {
    %c0_i32 = arith.constant 0 : i32
    %c0_i32_0 = arith.constant 0 : i32
    %c0_i32_1 = arith.constant 0 : i32
    return %c0_i32, %c0_i32_0 : i32, i32
  }
  func.func @transform_14(%arg0: i32) -> (i32, i32) {
    %c0_i32 = arith.constant 0 : i32
    %c0_i32_0 = arith.constant 0 : i32
    return %arg0, %c0_i32 : i32, i32
  }
}

</mosaic_0001>

<bundles_post_ra>
// kernel: tpu_custom_call.1
= control target key start
LH: loop header
LB: loop body
LE: loop exit
PB: predicated region body
PF: predicated region fallthrough
CT: control target
= control target key end

     0   :  { %s2043_s29 = smov 0   ;;  %s2895_s0 = inlined_call_operand.vmem [shape: f32[2,3], index: 0, kind: input, shape index: {}]   ;;  %s2896_s1 = inlined_call_operand.vmem [shape: f32[256,3], index: 1, kind: input, shape index: {}]   ;;  %s2897_s2 = inlined_call_operand.vmem [shape: f32[16,14], index: 2, kind: input, shape index: {}]   ;;  %s2898_s3 = inlined_call_operand.vmem [shape: f32[128,8], index: 3, kind: input, shape index: {}]   ;;  %s2899_s4 = inlined_call_operand.vmem [shape: f32[3,32], index: 4, kind: input, shape index: {}]   ;;  %s2900_s5 = inlined_call_operand.vmem [shape: f32[4,32], index: 5, kind: input, shape index: {}]   ;;  %s2901_s6 = inlined_call_operand.vmem [shape: f32[1,32], index: 6, kind: input, shape index: {}]   ;;  %s2902_s7 = inlined_call_operand.vmem [shape: f32[32,3], index: 7, kind: input, shape index: {}]   ;;  %s2903_s8 = inlined_call_operand.vmem [shape: f32[1,3], index: 8, kind: input, shape index: {}]   ;;  %s2904_s9 = inlined_call_operand.vmem [shape: f32[3,32], index: 9, kind: input, shape index: {}]   ;;  %s2905_s10 = inlined_call_operand.vmem [shape: f32[10,32], index: 10, kind: input, shape index: {}]   ;;  %s2906_s11 = inlined_call_operand.vmem [shape: f32[1,32], index: 11, kind: input, shape index: {}]   ;;  %s2907_s12 = inlined_call_operand.vmem [shape: f32[32,9], index: 12, kind: input, shape index: {}]   ;;  %s2908_s13 = inlined_call_operand.vmem [shape: f32[1,9], index: 13, kind: input, shape index: {}]   ;;  %s2909_s14 = inlined_call_operand.vmem [shape: f32[256,15], index: 14, kind: output, shape index: {}]  }
   0x1 LB: > { %s2049_s30 = sadd.s32 4294967295, %s1962_s29   ;;  %p1810_p0 = scmp.ge.s32.totalorder %s1962_s29, 1  ;;  %s1962_s29 = sphi %s2043_s29, %s24_s29  }
   0x2   : > { %p422_p1 = scmp.lt.s32.totalorder %s1962_s29, 3 }
   0x4   : > { %p423_p2 = pnand %p1810_p0, %p422_p1 }
   0x5   : > { %p478_p3 = scmp.lt.s32.totalorder (!%p423_p2), %s2049_s30, 1  ;;  %s1964_s24 = smov (!%p423_p2), 118  }
   0x6   : > { %426 = sbr.rel (%p423_p2) target bundleno = 984 (0x3d8), region = 76  ;;  %s1811_s27 = sshll.u32 (!%p423_p2), %s2049_s30, 4 }
   0x7   : > { %p473_p4 = scmp.lt.s32.totalorder (!%p423_p2), %s1811_s27, 31  ;;  %s1966_s18 = smov (!%p423_p2), 9  }
   0xb   : > { %v671_v0 = vld [vmem:[%s2905_s10 + $0x8] sm:$0x3]  ;;  %vm676_vm0 = vcmask 1041408   ;;  %v670_v1 = vld [vmem:[%s2905_s10] sm:$0xff]  ;;  %s479_s19 = scalar_select %p478_p3, %s2049_s30, 1  ;;  %vm672_vm1 = vcmask 80896  }
   0xc   : > { %1832 = vmatpush.msk.msra.mxu0 %vm676_vm0, %v671_v0  ;;  %v2067_v3 = vld [vmem:[%s2898_s3 + $0x48] sm:$0xff]  ;;  %vm700_vm2 = vcmask 64512   ;;  %v814_v5 = vld [vmem:[%s2900_s5] sm:$0xf]  ;;  %vm820_vm3 = vcmask 1043456   ;;  %v2077_v6 = vld [vmem:[%s2898_s3 + $0x50] sm:$0xff] }
   0xd   : > { %s1813_s20 = sshll.u32 %s479_s19, 3  ;;  %v2084_v7 = vld [vmem:[%s2898_s3 + $0x58] sm:$0xff]  ;;  %v2091_v8 = vld [vmem:[%s2898_s3 + $0x60] sm:$0xff]  ;;  %v2098_v9 = vld [vmem:[%s2898_s3 + $0x68] sm:$0xff]  ;;  %vm817_vm4 = vcmask 31744   ;;  %s2917_s27 = smov (!%p473_p4, %s1811_s27), 31 }
   0xe   : > { %695 = vmatpush.msra.mxu0 %v670_v1  ;;  %s481_s23 = scalar_lea.vmem %s2897_s2, %s1813_s20  ;;  %v2105_v10 = vld [vmem:[%s2898_s3 + $0x70] sm:$0xff]  ;;  %v2112_v11 = vld [vmem:[%s2898_s3 + $0x78] sm:$0xff]  ;;  %s1812_s28 = sshll.u32 %s2917_s27, 3  ;;  %v909_v16 = vld [vmem:[%s2899_s4] sm:$0x7]  ;;  %vm958_vm5 = vcmask 1042432  }
   0xf   : > { %v504_v2 = vld [vmem:[%s481_s23] sm:$0xff]  ;;  %s2129_s17 = scalar_lea.vmem %s2896_s1, %s1812_s28  ;;  %vm605_vm6 = vcmask 23552   ;;  %v506_v22 = vld [vmem:[%s2898_s3 + $0x8] sm:$0xff]  ;;  %v507_v25 = vld [vmem:[%s2898_s3 + $0x10] sm:$0xff]  ;;  %v1965_v56 = vmov 0.0   ;;  %vm1071_vm0 = vcmask 261120   ;;  %s2730_s21 = scalar_lea.vmem %s2909_s14, %s1812_s28 }
  0x10   : > { %1833 = vmatmul.msk.f32.vlgmr.msra.gmra.mxu0 %vm672_vm1, %v504_v2  ;;  %815 = vrot.lane.b32.xlu0 %v504_v2, %s1964_s24  ;;  %v2137_v17 = vld [vmem:[%s2129_s17] sm:$0xff]  ;;  %v2148_v20 = vld [vmem:[%s2129_s17 + $0x8] sm:$0xff]  ;;  %v2159_v23 = vld [vmem:[%s2129_s17 + $0x10] sm:$0xff]  ;;  %s1967_s19 = smov 12  }
  0x11   : > { %v505_v19 = vld [vmem:[%s2898_s3] sm:$0xff]  ;;  %v2170_v26 = vld [vmem:[%s2129_s17 + $0x18] sm:$0xff]  ;;  %v2191_v32 = vld [vmem:[%s2129_s17 + $0x28] sm:$0xff] }
  0x12   : > { %v508_v28 = vld [vmem:[%s2898_s3 + $0x18] sm:$0xff]  ;;  %v2181_v29 = vld [vmem:[%s2129_s17 + $0x20] sm:$0xff]  ;;  %v510_v33 = vld [vmem:[%s2898_s3 + $0x28] sm:$0xff] }
  0x13   : > { %v509_v31 = vld [vmem:[%s2898_s3 + $0x20] sm:$0xff]  ;;  %v2201_v34 = vld [vmem:[%s2129_s17 + $0x30] sm:$0xff]  ;;  %v512_v36 = vld [vmem:[%s2898_s3 + $0x38] sm:$0xff] }
  0x14   : > { %v511_v35 = vld [vmem:[%s2898_s3 + $0x30] sm:$0xff]  ;;  %v2214_v37 = vld [vmem:[%s2129_s17 + $0x38] sm:$0xff]  ;;  %v513_v39 = vld [vmem:[%s2898_s3 + $0x40] sm:$0xff] }
  0x15   : > { %v1066_v38 = vld [vmem:[%s2902_s7 + $0x18] sm:$0xff]  ;;  %v2227_v40 = vld [vmem:[%s2129_s17 + $0x40] sm:$0xff]  ;;  %v1065_v41 = vld [vmem:[%s2902_s7 + $0x10] sm:$0xff] }
  0x16   : > { %v2238_v42 = vld [vmem:[%s2129_s17 + $0x48] sm:$0xff]  ;;  %v2247_v43 = vld [vmem:[%s2129_s17 + $0x50] sm:$0xff]  ;;  %v2258_v45 = vld [vmem:[%s2129_s17 + $0x58] sm:$0xff] }
  0x17   : > { %v1064_v44 = vld [vmem:[%s2902_s7 + $0x8] sm:$0xff]  ;;  %v2266_v46 = vld [vmem:[%s2129_s17 + $0x60] sm:$0xff]  ;;  %v2280_v48 = vld [vmem:[%s2129_s17 + $0x70] sm:$0xff] }
  0x18   : > { %v2273_v47 = vld [vmem:[%s2129_s17 + $0x68] sm:$0xff]  ;;  %v2287_v49 = vld [vmem:[%s2129_s17 + $0x78] sm:$0xff]  ;;  %v1063_v51 = vld [vmem:[%s2902_s7] sm:$0xff] }
  0x19   : > { %v2299_v53 = vld [vmem:[%s2895_s0] ss:$0 sm:$0xff]  ;;  %v2304_v54 = vld [vmem:[%s2895_s0 + $0x1] ss:$0 sm:$0xff] }
  0x1a   : > { %vm524_vm7 = vcmp.ge.f32.partialorder %v2137_v17, %v2299_v53  ;;  %vm541_vm8 = vcmp.le.f32.partialorder %v2137_v17, %v2304_v54  ;;  %vm525_vm10 = vcmp.ge.f32.partialorder %v2148_v20, %v2299_v53  ;;  %vm542_vm11 = vcmp.le.f32.partialorder %v2148_v20, %v2304_v54  ;;  %v2325_v62 = vld [vmem:[%s2901_s6] ss:$0 sm:$0xff] }
  0x1b   : > { %vm557_vm9 = vmand %vm524_vm7, %vm541_vm8  ;;  %vm526_vm13 = vcmp.ge.f32.partialorder %v2159_v23, %v2299_v53  ;;  %vm543_vm14 = vcmp.le.f32.partialorder %v2159_v23, %v2304_v54  ;;  %vm527_vm1 = vcmp.ge.f32.partialorder %v2170_v26, %v2299_v53  ;;  %vm545_vm7 = vcmp.le.f32.partialorder %v2181_v29, %v2304_v54 }
  0x1c   : > { %v1816_v57 = vsel %vm557_vm9, 1.0, %v1965_v56  ;;  %vm558_vm12 = vmand %vm525_vm10, %vm542_vm11  ;;  %vm529_vm9 = vcmp.ge.f32.partialorder %v2191_v32, %v2299_v53  ;;  %vm546_vm10 = vcmp.le.f32.partialorder %v2191_v32, %v2304_v54 }
  0x1d   : > { %v606_v58 = vsel %vm605_vm6, %v1816_v57, 0.0  ;;  %v1817_v60 = vsel %vm558_vm12, 1.0, %v1965_v56  ;;  %vm559_vm15 = vmand %vm526_vm13, %vm543_vm14  ;;  %vm530_vm12 = vcmp.ge.f32.partialorder %v2201_v34, %v2299_v53  ;;  %vm547_vm13 = vcmp.le.f32.partialorder %v2201_v34, %v2304_v54 }
  0x1e   : > { %v609_v61 = vsel %vm605_vm6, %v1817_v60, 0.0  ;;  %v1818_v0 = vsel %vm559_vm15, 1.0, %v1965_v56  ;;  %vm562_vm11 = vmand %vm529_vm9, %vm546_vm10  ;;  %vm531_vm15 = vcmp.ge.f32.partialorder %v2214_v37, %v2299_v53  ;;  %v1201_v60 = vld [vmem:[%s2904_s9] sm:$0x7]  ;;  %vm533_vm10 = vcmp.ge.f32.partialorder %v2238_v42, %v2299_v53 }
  0x1f   : > { %610 = vadd.xlane.f32.xlu1 %v609_v61  ;;  %v612_v2 = vsel %vm605_vm6, %v1818_v0, 0.0  ;;  %vm563_vm14 = vmand %vm530_vm12, %vm547_vm13  ;;  %vm536_vm13 = vcmp.ge.f32.partialorder %v2266_v46, %v2299_v53 }
  0x27   : > { %613 = vadd.xlane.f32.xlu1 %v612_v2 }
  0x3a   : > { %607 = vadd.xlane.f32.xlu0 %v606_v58 }
  0x82   : > { %v816_v12 = vpop.permute.xlu0 %815 }
  0x8d   : > { %v697_v4 = vpop.f32.mrf.mxu0 }
  0x8e   : > { %764 = vmatpush.msra.mxu1 %v697_v4  ;;  %1936 = vmatpush.msra.mxu2 %v697_v4 }
  0x8f   : > { %1843 = vmatmul.msk.f32.vlgmr.msra.gmra.mxu2 %vm700_vm2, %v2067_v3  ;;  %1834 = vmatmul.msk.f32.vlgmr.msra.gmra.mxu1 %vm700_vm2, %v505_v19 }
  0x90   : > { %1850 = vmatpush.msk.msrb.mxu2 %vm820_vm3, %v814_v5  ;;  %1901 = vmatpush.msk.msrb.mxu1 %vm958_vm5, %v1201_v60 }
  0x92   : > { %1868 = vmatpush.msk.msra.mxu2 %vm958_vm5, %v909_v16  ;;  %vm534_vm5 = vcmp.ge.f32.partialorder %v2247_v43, %v2299_v53 }
  0x97   : > { %1844 = vmatmul.msk.f32.gmra.mxu2 %vm700_vm2, %v2077_v6  ;;  %1835 = vmatmul.msk.f32.gmra.mxu1 %vm700_vm2, %v506_v22 }
  0x9f   : > { %1845 = vmatmul.msk.f32.gmra.mxu2 %vm700_vm2, %v2084_v7  ;;  %1836 = vmatmul.msk.f32.gmra.mxu1 %vm700_vm2, %v507_v25 }
  0xa7   : > { %1846 = vmatmul.msk.f32.gmra.mxu2 %vm700_vm2, %v2091_v8  ;;  %1837 = vmatmul.msk.f32.gmra.mxu1 %vm700_vm2, %v508_v28 }
  0xaf   : > { %1847 = vmatmul.msk.f32.gmra.mxu2 %vm700_vm2, %v2098_v9  ;;  %1838 = vmatmul.msk.f32.gmra.mxu1 %vm700_vm2, %v509_v31 }
  0xb7   : > { %1848 = vmatmul.msk.f32.gmra.mxu2 %vm700_vm2, %v2105_v10  ;;  %1839 = vmatmul.msk.f32.gmra.mxu1 %vm700_vm2, %v510_v33 }
  0xbf   : > { %1849 = vmatmul.msk.f32.gmra.mxu2 %vm700_vm2, %v2112_v11  ;;  %1840 = vmatmul.msk.f32.gmra.mxu1 %vm700_vm2, %v511_v35 }
  0xc7   : > { %1851 = vmatmul.msk.f32.vlgmr.msrb.gmra.mxu2 %vm817_vm4, %v816_v12  ;;  %1841 = vmatmul.msk.f32.gmra.mxu1 %vm700_vm2, %v512_v36  ;;  %vm528_vm4 = vcmp.ge.f32.partialorder %v2181_v29, %v2299_v53 }
  0xc8   : > { %vm561_vm8 = vmand %vm528_vm4, %vm545_vm7  ;;  %vm549_vm4 = vcmp.le.f32.partialorder %v2227_v40, %v2304_v54 }
  0xcf   : > { %1869 = vmatmul.msk.f32.vlgmr.msra.gmra.mxu2 %vm605_vm6, %v2137_v17  ;;  %1842 = vmatmul.msk.f32.gmra.mxu1 %vm700_vm2, %v513_v39 }
  0xd7   : > { %1870 = vmatmul.msk.f32.gmra.mxu2 %vm605_vm6, %v2148_v20 }
  0xdf   : > { %1871 = vmatmul.msk.f32.gmra.mxu2 %vm605_vm6, %v2159_v23 }
  0xe7   : > { %1872 = vmatmul.msk.f32.gmra.mxu2 %vm605_vm6, %v2170_v26 }
  0xef   : > { %1873 = vmatmul.msk.f32.gmra.mxu2 %vm605_vm6, %v2181_v29 }
  0xf7   : > { %1874 = vmatmul.msk.f32.gmra.mxu2 %vm605_vm6, %v2191_v32 }
  0xff   : > { %1875 = vmatmul.msk.f32.gmra.mxu2 %vm605_vm6, %v2201_v34 }
 0x107   : > { %1876 = vmatmul.msk.f32.gmra.mxu2 %vm605_vm6, %v2214_v37 }
 0x10f   : > { %1877 = vmatmul.msk.f32.gmra.mxu2 %vm605_vm6, %v2227_v40 }
 0x112   : > { %v2117_v13 = vpop.f32.mrf.mxu2 }
 0x117   : > { %1878 = vmatmul.msk.f32.gmra.mxu2 %vm605_vm6, %v2238_v42 }
 0x11a   : > { %v2121_v14 = vpop.f32.mrf.mxu2 }
 0x11f   : > { %1879 = vmatmul.msk.f32.gmra.mxu2 %vm605_vm6, %v2247_v43 }
 0x122   : > { %v2131_v15 = vpop.f32.mrf.mxu2 }
 0x127   : > { %1880 = vmatmul.msk.f32.gmra.mxu2 %vm605_vm6, %v2258_v45 }
 0x12a   : > { %v2142_v18 = vpop.f32.mrf.mxu2 }
 0x12f   : > { %1881 = vmatmul.msk.f32.gmra.mxu2 %vm605_vm6, %v2266_v46 }
 0x132   : > { %v2153_v21 = vpop.f32.mrf.mxu2 }
 0x137   : > { %1882 = vmatmul.msk.f32.gmra.mxu2 %vm605_vm6, %v2273_v47 }
 0x13a   : > { %v2164_v24 = vpop.f32.mrf.mxu2 }
 0x13f   : > { %1883 = vmatmul.msk.f32.gmra.mxu2 %vm605_vm6, %v2280_v48 }
 0x142   : > { %v2175_v27 = vpop.f32.mrf.mxu2 }
 0x147   : > { %1884 = vmatmul.msk.f32.gmra.mxu2 %vm605_vm6, %v2287_v49 }
 0x14a   : > { %v841_v30 = vpop.f32.mrf.mxu2 }
 0x14b   : > { %859 = vmatpush.msrb.mxu0 %v841_v30  ;;  %1937 = vmatpush.msra.mxu3 %v841_v30 }
 0x14c   : > { %1852 = vmatmul.msk.f32.vlgmr.msrb.gmra.mxu0 %vm700_vm2, %v505_v19  ;;  %1859 = vmatmul.msk.f32.vlgmr.msra.gmra.mxu3 %vm700_vm2, %v512_v36  ;;  %v1820_v19 = vsel %vm561_vm8, 1.0, %v1965_v56  ;;  %vm551_vm8 = vcmp.le.f32.partialorder %v2247_v43, %v2304_v54 }
 0x14d   : > { %1132 = vmatpush.msra.mxu0 %v1066_v38  ;;  %vm567_vm9 = vmand %vm534_vm5, %vm551_vm8  ;;  %vm537_vm8 = vcmp.ge.f32.partialorder %v2273_v47, %v2299_v53 }
 0x14f   : > { %1133 = vmatpush.msra.mxu0 %v1065_v41 }
 0x151   : > { %1134 = vmatpush.msra.mxu0 %v1064_v44 }
 0x152   : > { %v979_v50 = vpop.f32.mrf.mxu2 }
 0x153   : > { %1135 = vmatpush.msra.mxu0 %v1063_v51 }
 0x154   : > { %1853 = vmatmul.msk.f32.gmra.mxu0 %vm700_vm2, %v506_v22  ;;  %1860 = vmatmul.msk.f32.gmra.mxu3 %vm700_vm2, %v513_v39 }
 0x15a   : > { %v982_v52 = vpop.f32.mrf.mxu2 }
 0x15c   : > { %1854 = vmatmul.msk.f32.gmra.mxu0 %vm700_vm2, %v507_v25  ;;  %1861 = vmatmul.msk.f32.gmra.mxu3 %vm700_vm2, %v2067_v3  ;;  %v618_v25 = vsel %vm605_vm6, %v1820_v19, 0.0 }
 0x162   : > { %v985_v55 = vpop.f32.mrf.mxu2 }
 0x164   : > { %1855 = vmatmul.msk.f32.gmra.mxu0 %vm700_vm2, %v508_v28  ;;  %1862 = vmatmul.msk.f32.gmra.mxu3 %vm700_vm2, %v2077_v6 }
 0x16a   : > { %v988_v59 = vpop.f32.mrf.mxu2 }
 0x16c   : > { %1856 = vmatmul.msk.f32.gmra.mxu0 %vm700_vm2, %v509_v31  ;;  %1863 = vmatmul.msk.f32.gmra.mxu3 %vm700_vm2, %v2084_v7 }
 0x172   : > { %v991_v3 = vpop.f32.mrf.mxu2 }
 0x174   : > { %1857 = vmatmul.msk.f32.gmra.mxu0 %vm700_vm2, %v510_v33  ;;  %1864 = vmatmul.msk.f32.gmra.mxu3 %vm700_vm2, %v2091_v8 }
 0x17c   : > { %1858 = vmatmul.msk.f32.gmra.mxu0 %vm700_vm2, %v511_v35  ;;  %1865 = vmatmul.msk.f32.gmra.mxu3 %vm700_vm2, %v2098_v9  ;;  %v1821_v35 = vsel %vm562_vm11, 1.0, %v1965_v56  ;;  %vm550_vm11 = vcmp.le.f32.partialorder %v2238_v42, %v2304_v54 }
 0x17d   : > { %v621_v38 = vsel %vm605_vm6, %v1821_v35, 0.0  ;;  %vm566_vm12 = vmand %vm533_vm10, %vm550_vm11  ;;  %vm539_vm11 = vcmp.ge.f32.partialorder %v2287_v49, %v2299_v53 }
 0x17e   : > { %622 = vadd.xlane.f32.xlu1 %v621_v38 }
 0x184   : > { %1866 = vmatmul.msk.f32.gmra.mxu3 %vm700_vm2, %v2105_v10 }
 0x18c   : > { %1867 = vmatmul.msk.f32.gmra.mxu3 %vm700_vm2, %v2112_v11  ;;  %vm544_vm2 = vcmp.le.f32.partialorder %v2170_v26, %v2304_v54  ;;  %v994_v11 = vpop.f32.mrf.mxu2 }
 0x18d   : > { %vm560_vm3 = vmand %vm527_vm1, %vm544_vm2  ;;  %vm548_vm1 = vcmp.le.f32.partialorder %v2214_v37, %v2304_v54 }
 0x18e   : > { %v1819_v7 = vsel %vm560_vm3, 1.0, %v1965_v56  ;;  %vm564_vm2 = vmand %vm531_vm15, %vm548_vm1  ;;  %vm532_vm3 = vcmp.ge.f32.partialorder %v2227_v40, %v2299_v53  ;;  %vm535_vm1 = vcmp.ge.f32.partialorder %v2258_v45, %v2299_v53 }
 0x18f   : > { %v615_v9 = vsel %vm605_vm6, %v1819_v7, 0.0  ;;  %vm565_vm7 = vmand %vm532_vm3, %vm549_vm4  ;;  %vm538_vm4 = vcmp.ge.f32.partialorder %v2280_v48, %v2299_v53 }
 0x190   : > { %616 = vadd.xlane.f32.xlu2 %v615_v9 }
 0x194   : > { %v997_v31 = vpop.f32.mrf.mxu2 }
 0x198   : > { %619 = vadd.xlane.f32.xlu2 %v618_v25  ;;  %v1826_v25 = vsel %vm567_vm9, 1.0, %v1965_v56  ;;  %vm554_vm9 = vcmp.le.f32.partialorder %v2273_v47, %v2304_v54 }
 0x199   : > { %vm570_vm10 = vmand %vm537_vm8, %vm554_vm9 }
 0x19c   : > { %v1000_v51 = vpop.f32.mrf.mxu2 }
 0x1c9   : > { %v861_v63 = vpop.f32.mrf.mxu0 }
 0x1ca   : > { %v980_v1 = vadd.f32 %v979_v50, %v861_v63  ;;  %v1823_v63 = vsel %vm564_vm2, 1.0, %v1965_v56  ;;  %vm552_vm2 = vcmp.le.f32.partialorder %v2258_v45, %v2304_v54 }
 0x1cb   : > { %vm568_vm3 = vmand %vm535_vm1, %vm552_vm2 }
 0x1cc   : > { %v1031_v4 = vadd.f32 %v2325_v62, %v980_v1  ;;  %v627_v1 = vsel %vm605_vm6, %v1823_v63, 0.0 }
 0x1cd   : > { %628 = vadd.xlane.f32.xlu1 %v627_v1  ;;  %v1829_v1 = vsel %vm570_vm10, 1.0, %v1965_v56 }
 0x1ce   : > { %v1047_v5 = vmax.f32 %v1031_v4, 0.0 }
 0x1cf   : > { %v882_v44 = vpop.f32.mrf.mxu3 }
 0x1d0   : > { %1885 = vmatmul.msk.f32.vlgmr.msra.gmra.mxu0 %vm1071_vm0, %v1047_v5 }
 0x1d1   : > { %v864_v6 = vpop.f32.mrf.mxu0 }
 0x1d2   : > { %v983_v8 = vadd.f32 %v982_v52, %v864_v6  ;;  %v1822_v52 = vsel %vm563_vm14, 1.0, %v1965_v56  ;;  %v1824_v6 = vsel %vm565_vm7, 1.0, %v1965_v56  ;;  %vm553_vm14 = vcmp.le.f32.partialorder %v2266_v46, %v2304_v54 }
 0x1d3   : > { %v624_v57 = vsel %vm605_vm6, %v1822_v52, 0.0  ;;  %vm569_vm15 = vmand %vm536_vm13, %vm553_vm14  ;;  %vm555_vm7 = vcmp.le.f32.partialorder %v2280_v48, %v2304_v54  ;;  %v1827_v52 = vsel %vm568_vm3, 1.0, %v1965_v56 }
 0x1d4   : > { %v1032_v10 = vadd.f32 %v2325_v62, %v983_v8  ;;  %625 = vadd.xlane.f32.xlu2 %v624_v57  ;;  %v630_v8 = vsel %vm605_vm6, %v1824_v6, 0.0  ;;  %vm571_vm5 = vmand %vm538_vm4, %vm555_vm7 }
 0x1d6   : > { %v1048_v12 = vmax.f32 %v1032_v10, 0.0 }
 0x1d7   : > { %v885_v2 = vpop.f32.mrf.mxu3 }
 0x1d8   : > { %1886 = vmatmul.msk.f32.gmra.mxu0 %vm1071_vm0, %v1048_v12 }
 0x1d9   : > { %v867_v16 = vpop.f32.mrf.mxu0 }
 0x1da   : > { %v986_v22 = vadd.f32 %v985_v55, %v867_v16 }
 0x1dc   : > { %v1033_v28 = vadd.f32 %v2325_v62, %v986_v22  ;;  %631 = vadd.xlane.f32.xlu2 %v630_v8 }
 0x1de   : > { %v1049_v30 = vmax.f32 %v1033_v28, 0.0  ;;  %v636_v28 = vsel %vm605_vm6, %v1826_v25, 0.0 }
 0x1df   : > { %v888_v12 = vpop.f32.mrf.mxu3 }
 0x1e0   : > { %1887 = vmatmul.msk.f32.gmra.mxu0 %vm1071_vm0, %v1049_v30  ;;  %v1825_v30 = vsel %vm566_vm12, 1.0, %v1965_v56  ;;  %vm556_vm12 = vcmp.le.f32.partialorder %v2287_v49, %v2304_v54 }
 0x1e1   : > { %v870_v33 = vpop.f32.mrf.mxu0  ;;  %vm572_vm13 = vmand %vm539_vm11, %vm556_vm12 }
 0x1e2   : > { %v989_v36 = vadd.f32 %v988_v59, %v870_v33 }
 0x1e4   : > { %v1034_v39 = vadd.f32 %v2325_v62, %v989_v36  ;;  %637 = vadd.xlane.f32.xlu2 %v636_v28 }
 0x1e6   : > { %v1050_v41 = vmax.f32 %v1034_v39, 0.0 }
 0x1e7   : > { %v891_v36 = vpop.f32.mrf.mxu3 }
 0x1e8   : > { %1888 = vmatmul.msk.f32.gmra.mxu0 %vm1071_vm0, %v1050_v41  ;;  %v1828_v41 = vsel %vm569_vm15, 1.0, %v1965_v56 }
 0x1e9   : > { %v873_v50 = vpop.f32.mrf.mxu0 }
 0x1ea   : > { %v992_v55 = vadd.f32 %v991_v3, %v873_v50  ;;  %v1003_v3 = vpop.f32.mrf.mxu2 }
 0x1eb   : > { %v1004_v35 = vadd.f32 %v1003_v3, %v885_v2  ;;  %v645_v2 = vsel %vm605_vm6, %v1829_v1, 0.0 }
 0x1ec   : > { %v1035_v58 = vadd.f32 %v2325_v62, %v992_v55  ;;  %v639_v55 = vsel %vm605_vm6, %v1827_v52, 0.0  ;;  %v2448_v52 = vpop.xlane.xlu0 %607 }
 0x1ed   : > { %v1039_v39 = vadd.f32 %v2325_v62, %v1004_v35  ;;  %vm654_vm14 = vcmp.gt.f32.partialorder %v2448_v52, 2.5 }
 0x1ee   : > { %v1051_v59 = vmax.f32 %v1035_v58, 0.0  ;;  %v1830_v58 = vsel %vm571_vm5, 1.0, %v1965_v56 }
 0x1ef   : > { %v1055_v50 = vmax.f32 %v1039_v39, 0.0 }
 0x1f0   : > { %1889 = vmatmul.msk.f32.gmra.mxu0 %vm1071_vm0, %v1051_v59  ;;  %v894_v59 = vpop.f32.mrf.mxu3 }
 0x1f1   : > { %v876_v61 = vpop.f32.mrf.mxu0 }
 0x1f2   : > { %v995_v0 = vadd.f32 %v994_v11, %v876_v61  ;;  %v1001_v11 = vadd.f32 %v1000_v51, %v882_v44  ;;  %v1006_v16 = vpop.f32.mrf.mxu2  ;;  %v642_v44 = vsel %vm605_vm6, %v1828_v41, 0.0  ;;  %v648_v61 = vsel %vm605_vm6, %v1830_v58, 0.0 }
 0x1f3   : > { %643 = vadd.xlane.f32.xlu2 %v642_v44  ;;  %v1007_v51 = vadd.f32 %v1006_v16, %v888_v12 }
 0x1f4   : > { %v1036_v4 = vadd.f32 %v2325_v62, %v995_v0  ;;  %v1038_v22 = vadd.f32 %v2325_v62, %v1001_v11 }
 0x1f5   : > { %v1040_v57 = vadd.f32 %v2325_v62, %v1007_v51  ;;  %v2446_v51 = vld [vmem:[%s2903_s8] ss:$0 sm:$0xff] }
 0x1f6   : > { %v1052_v5 = vmax.f32 %v1036_v4, 0.0  ;;  %v1054_v33 = vmax.f32 %v1038_v22, 0.0 }
 0x1f7   : > { %v1056_v63 = vmax.f32 %v1040_v57, 0.0 }
 0x1f8   : > { %1890 = vmatmul.msk.f32.gmra.mxu0 %vm1071_vm0, %v1052_v5  ;;  %v897_v4 = vpop.f32.mrf.mxu3 }
 0x1f9   : > { %v879_v7 = vpop.f32.mrf.mxu0 }
 0x1fa   : > { %v998_v9 = vadd.f32 %v997_v31, %v879_v7  ;;  %v633_v31 = vsel %vm605_vm6, %v1825_v30, 0.0  ;;  %v1009_v38 = vpop.f32.mrf.mxu2 }
 0x1fb   : > { %634 = vadd.xlane.f32.xlu1 %v633_v31  ;;  %649 = vadd.xlane.f32.xlu2 %v648_v61  ;;  %v1010_v0 = vadd.f32 %v1009_v38, %v891_v36 }
 0x1fc   : > { %v1037_v10 = vadd.f32 %v2325_v62, %v998_v9 }
 0x1fd   : > { %v1041_v3 = vadd.f32 %v2325_v62, %v1010_v0 }
 0x1fe   : > { %v1053_v19 = vmax.f32 %v1037_v10, 0.0 }
 0x1ff   : > { %v1057_v6 = vmax.f32 %v1041_v3, 0.0 }
 0x200   : > { %1891 = vmatmul.msk.f32.gmra.mxu0 %vm1071_vm0, %v1053_v19  ;;  %v900_v11 = vpop.f32.mrf.mxu3  ;;  %v1831_v19 = vsel %vm572_vm13, 1.0, %v1965_v56 }
 0x201   : > { %v651_v28 = vsel %vm605_vm6, %v1831_v19, 0.0 }
 0x202   : > { %v1012_v60 = vpop.f32.mrf.mxu2  ;;  %652 = vadd.xlane.f32.xlu0 %v651_v28 }
 0x203   : > { %640 = vadd.xlane.f32.xlu1 %v639_v55  ;;  %v1013_v7 = vadd.f32 %v1012_v60, %v894_v59  ;;  %v2453_v59 = vpop.xlane.xlu1 %610 }
 0x204   : > { %vm655_vm15 = vcmp.gt.f32.partialorder %v2453_v59, 2.5 }
 0x205   : > { %v1042_v8 = vadd.f32 %v2325_v62, %v1013_v7 }
 0x207   : > { %v1058_v9 = vmax.f32 %v1042_v8, 0.0 }
 0x208   : > { %1892 = vmatmul.msk.f32.gmra.mxu0 %vm1071_vm0, %v1054_v33  ;;  %v903_v30 = vpop.f32.mrf.mxu3 }
 0x20a   : > { %v1015_v5 = vpop.f32.mrf.mxu2 }
 0x20b   : > { %646 = vadd.xlane.f32.xlu1 %v645_v2  ;;  %v1016_v10 = vadd.f32 %v1015_v5, %v897_v4  ;;  %v2466_v0 = vpop.xlane.xlu1 %613 }
 0x20c   : > { %vm656_vm1 = vcmp.gt.f32.partialorder %v2466_v0, 2.5 }
 0x20d   : > { %v1043_v16 = vadd.f32 %v2325_v62, %v1016_v10 }
 0x20f   : > { %v1059_v22 = vmax.f32 %v1043_v16, 0.0 }
 0x210   : > { %1893 = vmatmul.msk.f32.gmra.mxu0 %vm1071_vm0, %v1055_v50  ;;  %v906_v54 = vpop.f32.mrf.mxu3 }
 0x212   : > { %v1018_v12 = vpop.f32.mrf.mxu2 }
 0x213   : > { %v1019_v25 = vadd.f32 %v1018_v12, %v900_v11  ;;  %v2508_v28 = vpop.xlane.xlu1 %622 }
 0x214   : > { %vm659_vm4 = vcmp.gt.f32.partialorder %v2508_v28, 2.5 }
 0x215   : > { %v1044_v33 = vadd.f32 %v2325_v62, %v1019_v25 }
 0x217   : > { %v1060_v35 = vmax.f32 %v1044_v33, 0.0 }
 0x218   : > { %1894 = vmatmul.msk.f32.gmra.mxu0 %vm1071_vm0, %v1056_v63 }
 0x21a   : > { %v1021_v31 = vpop.f32.mrf.mxu2 }
 0x21b   : > { %v1022_v36 = vadd.f32 %v1021_v31, %v903_v30  ;;  %v2510_v30 = vpop.f32.mrf.mxu1 }
 0x21d   : > { %v1045_v53 = vadd.f32 %v2325_v62, %v1022_v36 }
 0x21f   : > { %v1061_v39 = vmax.f32 %v1045_v53, 0.0 }
 0x220   : > { %1895 = vmatmul.msk.f32.gmra.mxu0 %vm1071_vm0, %v1057_v6  ;;  %v2481_v6 = vpop.xlane.xlu2 %616 }
 0x221   : > { %vm657_vm2 = vcmp.gt.f32.partialorder %v2481_v6, 2.5 }
 0x222   : > { %v1024_v38 = vpop.f32.mrf.mxu2 }
 0x223   : > { %v1025_v41 = vadd.f32 %v1024_v38, %v906_v54 }
 0x225   : > { %v1046_v44 = vadd.f32 %v2325_v62, %v1025_v41 }
 0x227   : > { %v1062_v50 = vmax.f32 %v1046_v44, 0.0 }
 0x228   : > { %1896 = vmatmul.msk.f32.gmra.mxu0 %vm1071_vm0, %v1058_v9  ;;  %v2493_v11 = vpop.xlane.xlu2 %619 }
 0x229   : > { %vm658_vm3 = vcmp.gt.f32.partialorder %v2493_v11, 2.5 }
 0x230   : > { %1897 = vmatmul.msk.f32.gmra.mxu0 %vm1071_vm0, %v1059_v22 }
 0x238   : > { %1898 = vmatmul.msk.f32.gmra.mxu0 %vm1071_vm0, %v1060_v35  ;;  %v1357_v35 = vld [vmem:[%s2907_s12 + $0x18] sm:$0xff] }
 0x239   : > { %1422 = vmatpush.msrb.mxu3 %v1357_v35 }
 0x240   : > { %1899 = vmatmul.msk.f32.gmra.mxu0 %vm1071_vm0, %v1061_v39  ;;  %v2529_v39 = vpop.f32.mrf.mxu1 }
 0x247   : > { %v2525_v54 = vpop.xlane.xlu2 %625 }
 0x248   : > { %1900 = vmatmul.msk.f32.gmra.mxu0 %vm1071_vm0, %v1062_v50  ;;  %vm660_vm7 = vcmp.gt.f32.partialorder %v2525_v54, 2.5 }
 0x24d   : > { %v1137_v55 = vpop.f32.mrf.mxu0 }
 0x24e   : > { %v1138_v57 = vadd.f32 %v2446_v51, %v1137_v55  ;;  %v2539_v55 = vpop.xlane.xlu1 %628 }
 0x24f   : > { %vm661_vm5 = vcmp.gt.f32.partialorder %v2539_v55, 2.5 }
 0x250   : > { %v1185_v58 = vadd.f32 %v1138_v57, %v2137_v17  ;;  %v1544_v62 = vsel %vm654_vm14, %v1138_v57, 0.0 }
 0x251   : > { %1576 = vrot.lane.b32.xlu1 %v1544_v62, %s1966_s18  ;;  %v1356_v62 = vld [vmem:[%s2907_s12 + $0x10] sm:$0xff] }
 0x252   : > { %1902 = vmatmul.msk.f32.vlgmr.msrb.gmra.mxu1 %vm605_vm6, %v1185_v58  ;;  %v1641_v60 = vsel %vm654_vm14, %v1185_v58, 0.0  ;;  %1423 = vmatpush.msrb.mxu3 %v1356_v62 }
 0x253   : > { %1673 = vrot.lane.b32.xlu2 %v1641_v60, %s1967_s19  ;;  %v2547_v60 = vpop.f32.mrf.mxu1 }
 0x255   : > { %v1140_v61 = vpop.f32.mrf.mxu0 }
 0x256   : > { %v1141_v63 = vadd.f32 %v2446_v51, %v1140_v61 }
 0x258   : > { %v1186_v17 = vadd.f32 %v1141_v63, %v2148_v20  ;;  %v1545_v1 = vsel %vm655_vm15, %v1141_v63, 0.0 }
 0x25a   : > { %1903 = vmatmul.msk.f32.gmra.mxu1 %vm605_vm6, %v1186_v17  ;;  %v1642_v2 = vsel %vm655_vm15, %v1186_v17, 0.0 }
 0x25b   : > { %1578 = vrot.lane.b32.xlu2 %v1545_v1, %s1966_s18  ;;  %1675 = vrot.lane.b32.xlu1 %v1642_v2, %s1967_s19 }
 0x25d   : > { %v1143_v3 = vpop.f32.mrf.mxu0 }
 0x25e   : > { %v1144_v4 = vadd.f32 %v2446_v51, %v1143_v3 }
 0x260   : > { %v1187_v20 = vadd.f32 %v1144_v4, %v2159_v23  ;;  %v1546_v5 = vsel %vm656_vm1, %v1144_v4, 0.0 }
 0x261   : > { %1580 = vrot.lane.b32.xlu0 %v1546_v5, %s1966_s18 }
 0x262   : > { %1904 = vmatmul.msk.f32.gmra.mxu1 %vm605_vm6, %v1187_v20  ;;  %v1643_v10 = vsel %vm656_vm1, %v1187_v20, 0.0  ;;  %v2568_v20 = vpop.f32.mrf.mxu1 }
 0x265   : > { %v1146_v7 = vpop.f32.mrf.mxu0 }
 0x266   : > { %v1147_v8 = vadd.f32 %v2446_v51, %v1146_v7 }
 0x268   : > { %v1188_v9 = vadd.f32 %v1147_v8, %v2170_v26  ;;  %v1547_v19 = vsel %vm657_vm2, %v1147_v8, 0.0 }
 0x269   : > { %1677 = vrot.lane.b32.xlu0 %v1643_v10, %s1967_s19 }
 0x26a   : > { %1905 = vmatmul.msk.f32.gmra.mxu1 %vm605_vm6, %v1188_v9  ;;  %v1644_v23 = vsel %vm657_vm2, %v1188_v9, 0.0  ;;  %v1355_v9 = vld [vmem:[%s2907_s12 + $0x8] sm:$0xff] }
 0x26b   : > { %1679 = vrot.lane.b32.xlu2 %v1644_v23, %s1967_s19  ;;  %1424 = vmatpush.msrb.mxu3 %v1355_v9 }
 0x26d   : > { %v1149_v12 = vpop.f32.mrf.mxu0 }
 0x26e   : > { %v1150_v16 = vadd.f32 %v2446_v51, %v1149_v12  ;;  %v2570_v5 = vpop.xlane.xlu1 %634 }
 0x26f   : > { %vm663_vm9 = vcmp.gt.f32.partialorder %v2570_v5, 2.5 }
 0x270   : > { %v1189_v26 = vadd.f32 %v1150_v16, %v2181_v29  ;;  %v1548_v22 = vsel %vm658_vm3, %v1150_v16, 0.0  ;;  %v2585_v16 = vpop.f32.mrf.mxu1 }
 0x271   : > { %1582 = vrot.lane.b32.xlu0 %v1547_v19, %s1966_s18 }
 0x272   : > { %1906 = vmatmul.msk.f32.gmra.mxu1 %vm605_vm6, %v1189_v26  ;;  %v1645_v25 = vsel %vm658_vm3, %v1189_v26, 0.0 }
 0x273   : > { %1584 = vrot.lane.b32.xlu2 %v1548_v22, %s1966_s18  ;;  %1681 = vrot.lane.b32.xlu1 %v1645_v25, %s1967_s19 }
 0x275   : > { %v1152_v29 = vpop.f32.mrf.mxu0 }
 0x276   : > { %v1153_v31 = vadd.f32 %v2446_v51, %v1152_v29  ;;  %v2599_v29 = vpop.xlane.xlu1 %640 }
 0x277   : > { %vm2911_vm11 = vcmp.gt.f32.partialorder %v2599_v29, 2.5 }
 0x278   : > { %v1190_v33 = vadd.f32 %v1153_v31, %v2191_v32  ;;  %v1549_v53 = vsel %vm659_vm4, %v1153_v31, 0.0 }
 0x27a   : > { %1907 = vmatmul.msk.f32.gmra.mxu1 %vm605_vm6, %v1190_v33  ;;  %v1646_v36 = vsel %vm659_vm4, %v1190_v33, 0.0 }
 0x27b   : > { %1683 = vrot.lane.b32.xlu0 %v1646_v36, %s1967_s19  ;;  %1586 = vrot.lane.b32.xlu1 %v1549_v53, %s1966_s18 }
 0x27d   : > { %v1155_v32 = vpop.f32.mrf.mxu0 }
 0x27e   : > { %v1156_v38 = vadd.f32 %v2446_v51, %v1155_v32  ;;  %v1354_v32 = vld [vmem:[%s2907_s12] sm:$0xff] }
 0x27f   : > { %1425 = vmatpush.msrb.mxu3 %v1354_v32 }
 0x280   : > { %v1191_v41 = vadd.f32 %v1156_v38, %v2201_v34  ;;  %v1550_v44 = vsel %vm660_vm7, %v1156_v38, 0.0 }
 0x282   : > { %1908 = vmatmul.msk.f32.gmra.mxu1 %vm605_vm6, %v1191_v41  ;;  %v1647_v50 = vsel %vm660_vm7, %v1191_v41, 0.0 }
 0x283   : > { %1588 = vrot.lane.b32.xlu0 %v1550_v44, %s1966_s18  ;;  %1685 = vrot.lane.b32.xlu2 %v1647_v50, %s1967_s19 }
 0x285   : > { %v1158_v57 = vpop.f32.mrf.mxu0 }
 0x286   : > { %v1159_v58 = vadd.f32 %v2446_v51, %v1158_v57 }
 0x288   : > { %v1192_v34 = vadd.f32 %v1159_v58, %v2214_v37  ;;  %v1551_v61 = vsel %vm661_vm5, %v1159_v58, 0.0  ;;  %v2556_v37 = vpop.xlane.xlu2 %631 }
 0x289   : > { %vm662_vm8 = vcmp.gt.f32.partialorder %v2556_v37, 2.5 }
 0x28a   : > { %1909 = vmatmul.msk.f32.gmra.mxu1 %vm605_vm6, %v1192_v34  ;;  %v1648_v63 = vsel %vm661_vm5, %v1192_v34, 0.0  ;;  %v2630_v34 = vpop.xlane.xlu1 %646 }
 0x28b   : > { %1590 = vrot.lane.b32.xlu2 %v1551_v61, %s1966_s18  ;;  %1687 = vrot.lane.b32.xlu1 %v1648_v63, %s1967_s19  ;;  %vm667_vm13 = vcmp.gt.f32.partialorder %v2630_v34, 2.5 }
 0x28d   : > { %v1161_v17 = vpop.f32.mrf.mxu0 }
 0x28e   : > { %v1162_v1 = vadd.f32 %v2446_v51, %v1161_v17 }
 0x290   : > { %v1193_v2 = vadd.f32 %v1162_v1, %v2227_v40  ;;  %v1552_v4 = vsel %vm662_vm8, %v1162_v1, 0.0 }
 0x292   : > { %1910 = vmatmul.msk.f32.gmra.mxu1 %vm605_vm6, %v1193_v2  ;;  %v1649_v3 = vsel %vm662_vm8, %v1193_v2, 0.0 }
 0x293   : > { %1689 = vrot.lane.b32.xlu0 %v1649_v3, %s1967_s19  ;;  %1592 = vrot.lane.b32.xlu1 %v1552_v4, %s1966_s18 }
 0x295   : > { %v1164_v7 = vpop.f32.mrf.mxu0 }
 0x296   : > { %v1165_v8 = vadd.f32 %v2446_v51, %v1164_v7  ;;  %v2648_v7 = vpop.xlane.xlu0 %652 }
 0x298   : > { %v1194_v40 = vadd.f32 %v1165_v8, %v2238_v42  ;;  %v1553_v10 = vsel %vm663_vm9, %v1165_v8, 0.0  ;;  %v2587_v42 = vpop.xlane.xlu2 %637 }
 0x299   : > { %vm664_vm10 = vcmp.gt.f32.partialorder %v2587_v42, 2.5 }
 0x29a   : > { %1911 = vmatmul.msk.f32.gmra.mxu1 %vm605_vm6, %v1194_v40  ;;  %v1650_v23 = vsel %vm663_vm9, %v1194_v40, 0.0 }
 0x29b   : > { %1594 = vrot.lane.b32.xlu0 %v1553_v10, %s1966_s18  ;;  %1691 = vrot.lane.b32.xlu2 %v1650_v23, %s1967_s19 }
 0x29d   : > { %v1167_v12 = vpop.f32.mrf.mxu0 }
 0x29e   : > { %v1168_v26 = vadd.f32 %v2446_v51, %v1167_v12 }
 0x2a0   : > { %v1195_v19 = vadd.f32 %v1168_v26, %v2247_v43  ;;  %v1554_v22 = vsel %vm664_vm10, %v1168_v26, 0.0  ;;  %v2603_v43 = vpop.f32.mrf.mxu1  ;;  %v2616_v41 = vpop.xlane.xlu2 %643 }
 0x2a1   : > { %vm2910_vm12 = vcmp.gt.f32.partialorder %v2616_v41, 2.5 }
 0x2a2   : > { %1912 = vmatmul.msk.f32.gmra.mxu1 %vm605_vm6, %v1195_v19  ;;  %v1651_v25 = vsel %vm664_vm10, %v1195_v19, 0.0 }
 0x2a3   : > { %1596 = vrot.lane.b32.xlu2 %v1554_v22, %s1966_s18  ;;  %1693 = vrot.lane.b32.xlu1 %v1651_v25, %s1967_s19 }
 0x2a5   : > { %v1170_v31 = vpop.f32.mrf.mxu0 }
 0x2a6   : > { %v1171_v33 = vadd.f32 %v2446_v51, %v1170_v31 }
 0x2a8   : > { %v1196_v35 = vadd.f32 %v1171_v33, %v2258_v45  ;;  %v1555_v53 = vsel %vm2911_vm11, %v1171_v33, 0.0  ;;  %v2621_v50 = vpop.f32.mrf.mxu1  ;;  %v2639_v1 = vpop.xlane.xlu2 %649 }
 0x2aa   : > { %1913 = vmatmul.msk.f32.gmra.mxu1 %vm605_vm6, %v1196_v35  ;;  %v1652_v36 = vsel %vm2911_vm11, %v1196_v35, 0.0  ;;  %vm2912_vm11 = vcmp.gt.f32.partialorder %v2648_v7, 2.5 }
 0x2ab   : > { %1695 = vrot.lane.b32.xlu0 %v1652_v36, %s1967_s19  ;;  %1598 = vrot.lane.b32.xlu1 %v1555_v53, %s1966_s18 }
 0x2ad   : > { %v1173_v38 = vpop.f32.mrf.mxu0 }
 0x2ae   : > { %v1174_v45 = vadd.f32 %v2446_v51, %v1173_v38 }
 0x2b0   : > { %v1197_v44 = vadd.f32 %v1174_v45, %v2266_v46  ;;  %v1556_v57 = vsel %vm2910_vm12, %v1174_v45, 0.0  ;;  %v787_v17 = vpop.f32.mrf.mxu1 }
 0x2b2   : > { %1914 = vmatmul.msk.f32.gmra.mxu1 %vm605_vm6, %v1197_v44  ;;  %v1653_v58 = vsel %vm2910_vm12, %v1197_v44, 0.0  ;;  %vm668_vm12 = vcmp.gt.f32.partialorder %v2639_v1, 2.5 }
 0x2b3   : > { %1600 = vrot.lane.b32.xlu0 %v1556_v57, %s1966_s18  ;;  %1697 = vrot.lane.b32.xlu2 %v1653_v58, %s1967_s19 }
 0x2b5   : > { %v1176_v62 = vpop.f32.mrf.mxu0 }
 0x2b6   : > { %v1177_v61 = vadd.f32 %v2446_v51, %v1176_v62 }
 0x2b8   : > { %v1198_v46 = vadd.f32 %v1177_v61, %v2273_v47  ;;  %v1557_v63 = vsel %vm667_vm13, %v1177_v61, 0.0  ;;  %v790_v40 = vpop.f32.mrf.mxu1 }
 0x2ba   : > { %1915 = vmatmul.msk.f32.gmra.mxu1 %vm605_vm6, %v1198_v46 }
 0x2bb   : > { %1602 = vrot.lane.b32.xlu2 %v1557_v63, %s1966_s18 }
 0x2bd   : > { %v1179_v2 = vpop.f32.mrf.mxu0 }
 0x2be   : > { %v1180_v3 = vadd.f32 %v2446_v51, %v1179_v2 }
 0x2c0   : > { %v1199_v4 = vadd.f32 %v1180_v3, %v2280_v48  ;;  %v1558_v47 = vsel %vm668_vm12, %v1180_v3, 0.0  ;;  %v1654_v48 = vsel %vm667_vm13, %v1198_v46, 0.0 }
 0x2c1   : > { %1604 = vrot.lane.b32.xlu1 %v1558_v47, %s1966_s18 }
 0x2c2   : > { %1916 = vmatmul.msk.f32.gmra.mxu1 %vm605_vm6, %v1199_v4  ;;  %v1655_v19 = vsel %vm668_vm12, %v1199_v4, 0.0 }
 0x2c5   : > { %v1182_v8 = vpop.f32.mrf.mxu0 }
 0x2c6   : > { %v1183_v9 = vadd.f32 %v2446_v51, %v1182_v8 }
 0x2c8   : > { %v1200_v10 = vadd.f32 %v1183_v9, %v2287_v49  ;;  %v1559_v23 = vsel %vm2912_vm11, %v1183_v9, 0.0  ;;  %v2666_v49 = vld [vmem:[%s2906_s11] ss:$0 sm:$0xff] }
 0x2c9   : > { %1699 = vrot.lane.b32.xlu1 %v1654_v48, %s1967_s19  ;;  %1606 = vrot.lane.b32.xlu0 %v1559_v23, %s1966_s18 }
 0x2ca   : > { %1917 = vmatmul.msk.f32.gmra.mxu1 %vm605_vm6, %v1200_v10  ;;  %v1656_v12 = vsel %vm2912_vm11, %v1200_v10, 0.0  ;;  %vm1624_vm11 = vcmask 97352  }
 0x2cb   : > { %1703 = vrot.lane.b32.xlu2 %v1656_v12, %s1967_s19 }
 0x2cf   : > { %v1270_v51 = vpop.f32.mrf.mxu1 }
 0x2d0   : > { %v1271_v26 = vadd.f32 %v1270_v51, %v2510_v30 }
 0x2d1   : > { %1701 = vrot.lane.b32.xlu0 %v1655_v19, %s1967_s19 }
 0x2d2   : > { %v1322_v22 = vadd.f32 %v2666_v49, %v1271_v26 }
 0x2d4   : > { %v1338_v25 = vmax.f32 %v1322_v22, 0.0 }
 0x2d6   : > { %1918 = vmatmul.msk.f32.vlgmr.msrb.gmra.mxu3 %vm1071_vm0, %v1338_v25 }
 0x2d7   : > { %v1273_v31 = vpop.f32.mrf.mxu1 }
 0x2d8   : > { %v1274_v33 = vadd.f32 %v1273_v31, %v2529_v39 }
 0x2da   : > { %v1323_v35 = vadd.f32 %v2666_v49, %v1274_v33 }
 0x2dc   : > { %v1339_v36 = vmax.f32 %v1323_v35, 0.0 }
 0x2de   : > { %1919 = vmatmul.msk.f32.gmra.mxu3 %vm1071_vm0, %v1339_v36 }
 0x2df   : > { %v1276_v53 = vpop.f32.mrf.mxu1 }
 0x2e0   : > { %v1277_v30 = vadd.f32 %v1276_v53, %v2547_v60 }
 0x2e2   : > { %v1324_v32 = vadd.f32 %v2666_v49, %v1277_v30 }
 0x2e4   : > { %v1340_v38 = vmax.f32 %v1324_v32, 0.0 }
 0x2e6   : > { %1920 = vmatmul.msk.f32.gmra.mxu3 %vm1071_vm0, %v1340_v38 }
 0x2e7   : > { %v1279_v45 = vpop.f32.mrf.mxu1 }
 0x2e8   : > { %v1280_v44 = vadd.f32 %v1279_v45, %v2568_v20 }
 0x2ea   : > { %v1325_v57 = vadd.f32 %v2666_v49, %v1280_v44 }
 0x2ec   : > { %v1341_v58 = vmax.f32 %v1325_v57, 0.0 }
 0x2ee   : > { %1921 = vmatmul.msk.f32.gmra.mxu3 %vm1071_vm0, %v1341_v58 }
 0x2ef   : > { %v1282_v39 = vpop.f32.mrf.mxu1 }
 0x2f0   : > { %v1283_v62 = vadd.f32 %v1282_v39, %v2585_v16 }
 0x2f2   : > { %v1326_v61 = vadd.f32 %v2666_v49, %v1283_v62 }
 0x2f4   : > { %v1342_v46 = vmax.f32 %v1326_v61, 0.0 }
 0x2f6   : > { %1922 = vmatmul.msk.f32.gmra.mxu3 %vm1071_vm0, %v1342_v46 }
 0x2f7   : > { %v1285_v60 = vpop.f32.mrf.mxu1 }
 0x2f8   : > { %v1286_v63 = vadd.f32 %v1285_v60, %v2603_v43  ;;  %v1475_v60 = vlaneseq }
 0x2fa   : > { %v1327_v2 = vadd.f32 %v2666_v49, %v1286_v63  ;;  %v1476_v63 = vand.u32 127, %v1475_v60 }
 0x2fc   : > { %v1343_v3 = vmax.f32 %v1327_v2, 0.0  ;;  %v2720_v2 = vld [vmem:[%s2908_s13] ss:$0 sm:$0xff]  ;;  %vm1477_vm6 = vcmp.eq.s32.totalorder %v1476_v63, 8 }
 0x2fe   : > { %1923 = vmatmul.msk.f32.gmra.mxu3 %vm1071_vm0, %v1343_v3  ;;  %v2723_v3 = vsel %vm1477_vm6, -100000.0, %v1965_v56  ;;  %vm1721_vm6 = vcmask 121952  }
 0x2ff   : > { %v1288_v20 = vpop.f32.mrf.mxu1 }
 0x300   : > { %v1289_v4 = vadd.f32 %v1288_v20, %v2621_v50  ;;  %v1577_v20 = vpop.permute.xlu1 %1576 }
 0x302   : > { %v1328_v47 = vadd.f32 %v2666_v49, %v1289_v4  ;;  %v1581_v4 = vpop.permute.xlu0 %1580 }
 0x304   : > { %v1344_v8 = vmax.f32 %v1328_v47, 0.0 }
 0x306   : > { %1924 = vmatmul.msk.f32.gmra.mxu3 %vm1071_vm0, %v1344_v8 }
 0x307   : > { %v1291_v16 = vpop.f32.mrf.mxu1 }
 0x308   : > { %v1292_v9 = vadd.f32 %v1291_v16, %v787_v17 }
 0x30a   : > { %v1329_v10 = vadd.f32 %v2666_v49, %v1292_v9  ;;  %v1676_v9 = vpop.permute.xlu1 %1675 }
 0x30c   : > { %v1345_v48 = vmax.f32 %v1329_v10, 0.0 }
 0x30e   : > { %1925 = vmatmul.msk.f32.gmra.mxu3 %vm1071_vm0, %v1345_v48 }
 0x30f   : > { %v1294_v43 = vpop.f32.mrf.mxu1 }
 0x310   : > { %v1295_v23 = vadd.f32 %v1294_v43, %v790_v40  ;;  %v1678_v43 = vpop.permute.xlu0 %1677 }
 0x312   : > { %v1330_v12 = vadd.f32 %v2666_v49, %v1295_v23 }
 0x314   : > { %v1346_v51 = vmax.f32 %v1330_v12, 0.0 }
 0x316   : > { %1926 = vmatmul.msk.f32.gmra.mxu3 %vm1071_vm0, %v1346_v51 }
 0x317   : > { %v1297_v50 = vpop.f32.mrf.mxu1 }
 0x318   : > { %v1298_v26 = vadd.f32 %v1297_v50, %v2117_v13 }
 0x31a   : > { %v1331_v19 = vadd.f32 %v2666_v49, %v1298_v26  ;;  %v1583_v26 = vpop.permute.xlu0 %1582 }
 0x31c   : > { %v1347_v22 = vmax.f32 %v1331_v19, 0.0 }
 0x31e   : > { %1927 = vmatmul.msk.f32.gmra.mxu3 %vm1071_vm0, %v1347_v22  ;;  %v1682_v22 = vpop.permute.xlu1 %1681 }
 0x31f   : > { %v1300_v17 = vpop.f32.mrf.mxu1 }
 0x320   : > { %v1301_v25 = vadd.f32 %v1300_v17, %v2121_v14 }
 0x322   : > { %v1332_v31 = vadd.f32 %v2666_v49, %v1301_v25 }
 0x324   : > { %v1348_v33 = vmax.f32 %v1332_v31, 0.0 }
 0x326   : > { %1928 = vmatmul.msk.f32.gmra.mxu3 %vm1071_vm0, %v1348_v33  ;;  %v1684_v33 = vpop.permute.xlu0 %1683  ;;  %v1587_v11 = vpop.permute.xlu1 %1586 }
 0x327   : > { %v1303_v40 = vpop.f32.mrf.mxu1 }
 0x328   : > { %v1304_v35 = vadd.f32 %v1303_v40, %v2131_v15 }
 0x32a   : > { %v1333_v36 = vadd.f32 %v2666_v49, %v1304_v35 }
 0x32c   : > { %v1349_v53 = vmax.f32 %v1333_v36, 0.0 }
 0x32e   : > { %1929 = vmatmul.msk.f32.gmra.mxu3 %vm1071_vm0, %v1349_v53  ;;  %v1589_v28 = vpop.permute.xlu0 %1588 }
 0x32f   : > { %v1306_v13 = vpop.f32.mrf.mxu1 }
 0x330   : > { %v1307_v30 = vadd.f32 %v1306_v13, %v2142_v18 }
 0x332   : > { %v1334_v32 = vadd.f32 %v2666_v49, %v1307_v30 }
 0x334   : > { %v1350_v38 = vmax.f32 %v1334_v32, 0.0 }
 0x336   : > { %1930 = vmatmul.msk.f32.gmra.mxu3 %vm1071_vm0, %v1350_v38  ;;  %v1688_v38 = vpop.permute.xlu1 %1687 }
 0x337   : > { %v1309_v14 = vpop.f32.mrf.mxu1 }
 0x338   : > { %v1310_v45 = vadd.f32 %v1309_v14, %v2153_v21 }
 0x33a   : > { %v1335_v44 = vadd.f32 %v2666_v49, %v1310_v45 }
 0x33c   : > { %v1351_v57 = vmax.f32 %v1335_v44, 0.0 }
 0x33e   : > { %1931 = vmatmul.msk.f32.gmra.mxu3 %vm1071_vm0, %v1351_v57  ;;  %v1690_v57 = vpop.permute.xlu0 %1689  ;;  %v1593_v55 = vpop.permute.xlu1 %1592 }
 0x33f   : > { %v1312_v15 = vpop.f32.mrf.mxu1 }
 0x340   : > { %v1313_v58 = vadd.f32 %v1312_v15, %v2164_v24 }
 0x342   : > { %v1336_v39 = vadd.f32 %v2666_v49, %v1313_v58 }
 0x344   : > { %v1352_v18 = vmax.f32 %v1336_v39, 0.0 }
 0x346   : > { %1932 = vmatmul.msk.f32.gmra.mxu3 %vm1071_vm0, %v1352_v18  ;;  %v1595_v37 = vpop.permute.xlu0 %1594 }
 0x347   : > { %v1315_v62 = vpop.f32.mrf.mxu1 }
 0x348   : > { %v1316_v61 = vadd.f32 %v1315_v62, %v2175_v27 }
 0x34a   : > { %v1337_v46 = vadd.f32 %v2666_v49, %v1316_v61  ;;  %v1674_v49 = vpop.permute.xlu2 %1673 }
 0x34c   : > { %v1353_v21 = vmax.f32 %v1337_v46, 0.0  ;;  %v1694_v46 = vpop.permute.xlu1 %1693 }
 0x34e   : > { %1933 = vmatmul.msk.f32.gmra.mxu3 %vm1071_vm0, %v1353_v21  ;;  %vm1527_vm0 = vcmask 72704  }
 0x352   : > { %v1579_v16 = vpop.permute.xlu2 %1578 }
 0x359   : > { %v1427_v24 = vpop.f32.mrf.mxu3 }
 0x35a   : > { %v1428_v27 = vadd.f32 %v2720_v2, %v1427_v24  ;;  %v1680_v51 = vpop.permute.xlu2 %1679  ;;  %v1696_v24 = vpop.permute.xlu0 %1695 }
 0x35c   : > { %v1511_v56 = vsel %vm654_vm14, %v1428_v27, %v2723_v3  ;;  %vm2913_vm14 = vcmp.gt.f32.partialorder %v2599_v29, 2.5 }
 0x35d   : > { %1528 = vst.msk [vmem:[%s2730_s21] sm:$0xff] %vm1527_vm0, %v1511_v56 }
 0x35e   : > { %1625 = vst.msk [vmem:[%s2730_s21] sm:$0xff] %vm1624_vm11, %v1577_v20 }
 0x35f   : > { %1722 = vst.msk [vmem:[%s2730_s21] sm:$0xff] %vm1721_vm6, %v1674_v49  ;;  %v1599_v49 = vpop.permute.xlu1 %1598 }
 0x361   : > { %v1430_v47 = vpop.f32.mrf.mxu3 }
 0x362   : > { %v1431_v8 = vadd.f32 %v2720_v2, %v1430_v47  ;;  %v1585_v6 = vpop.permute.xlu2 %1584  ;;  %v1601_v47 = vpop.permute.xlu0 %1600 }
 0x364   : > { %v1512_v52 = vsel %vm655_vm15, %v1431_v8, %v2723_v3  ;;  %vm2914_vm15 = vcmp.gt.f32.partialorder %v2616_v41, 2.5 }
 0x365   : > { %1529 = vst.msk [vmem:[%s2730_s21 + $0x8] sm:$0xff] %vm1527_vm0, %v1512_v52 }
 0x366   : > { %1626 = vst.msk [vmem:[%s2730_s21 + $0x8] sm:$0xff] %vm1624_vm11, %v1579_v16 }
 0x367   : > { %1723 = vst.msk [vmem:[%s2730_s21 + $0x8] sm:$0xff] %vm1721_vm6, %v1676_v9  ;;  %v1605_v8 = vpop.permute.xlu1 %1604 }
 0x369   : > { %v1433_v10 = vpop.f32.mrf.mxu3 }
 0x36a   : > { %v1434_v48 = vadd.f32 %v2720_v2, %v1433_v10  ;;  %v1686_v53 = vpop.permute.xlu2 %1685  ;;  %v1607_v9 = vpop.permute.xlu0 %1606 }
 0x36c   : > { %v1513_v59 = vsel %vm656_vm1, %v1434_v48, %v2723_v3  ;;  %vm2915_vm1 = vcmp.gt.f32.partialorder %v2648_v7, 2.5 }
 0x36d   : > { %1530 = vst.msk [vmem:[%s2730_s21 + $0x10] sm:$0xff] %vm1527_vm0, %v1513_v59 }
 0x36e   : > { %1627 = vst.msk [vmem:[%s2730_s21 + $0x10] sm:$0xff] %vm1624_vm11, %v1581_v4 }
 0x36f   : > { %1724 = vst.msk [vmem:[%s2730_s21 + $0x10] sm:$0xff] %vm1721_vm6, %v1678_v43  ;;  %v1700_v48 = vpop.permute.xlu1 %1699 }
 0x371   : > { %v1436_v23 = vpop.f32.mrf.mxu3 }
 0x372   : > { %v1437_v12 = vadd.f32 %v2720_v2, %v1436_v23  ;;  %v1591_v54 = vpop.permute.xlu2 %1590  ;;  %v1702_v34 = vpop.permute.xlu0 %1701 }
 0x374   : > { %v1514_v50 = vsel %vm657_vm2, %v1437_v12, %v2723_v3 }
 0x375   : > { %1531 = vst.msk [vmem:[%s2730_s21 + $0x18] sm:$0xff] %vm1527_vm0, %v1514_v50 }
 0x376   : > { %1628 = vst.msk [vmem:[%s2730_s21 + $0x18] sm:$0xff] %vm1624_vm11, %v1583_v26 }
 0x377   : > { %1725 = vst.msk [vmem:[%s2730_s21 + $0x18] sm:$0xff] %vm1721_vm6, %v1680_v51 }
 0x379   : > { %v1439_v0 = vpop.f32.mrf.mxu3 }
 0x37a   : > { %v1440_v19 = vadd.f32 %v2720_v2, %v1439_v0  ;;  %v1692_v18 = vpop.permute.xlu2 %1691 }
 0x37c   : > { %v1515_v17 = vsel %vm658_vm3, %v1440_v19, %v2723_v3 }
 0x37d   : > { %1532 = vst.msk [vmem:[%s2730_s21 + $0x20] sm:$0xff] %vm1527_vm0, %v1515_v17 }
 0x37e   : > { %1629 = vst.msk [vmem:[%s2730_s21 + $0x20] sm:$0xff] %vm1624_vm11, %v1585_v6 }
 0x37f   : > { %1726 = vst.msk [vmem:[%s2730_s21 + $0x20] sm:$0xff] %vm1721_vm6, %v1682_v22 }
 0x381   : > { %v1442_v25 = vpop.f32.mrf.mxu3 }
 0x382   : > { %v1443_v31 = vadd.f32 %v2720_v2, %v1442_v25  ;;  %v1597_v5 = vpop.permute.xlu2 %1596 }
 0x384   : > { %v1516_v40 = vsel %vm659_vm4, %v1443_v31, %v2723_v3 }
 0x385   : > { %1533 = vst.msk [vmem:[%s2730_s21 + $0x28] sm:$0xff] %vm1527_vm0, %v1516_v40 }
 0x386   : > { %1630 = vst.msk [vmem:[%s2730_s21 + $0x28] sm:$0xff] %vm1624_vm11, %v1587_v11 }
 0x387   : > { %1727 = vst.msk [vmem:[%s2730_s21 + $0x28] sm:$0xff] %vm1721_vm6, %v1684_v33 }
 0x389   : > { %v1445_v35 = vpop.f32.mrf.mxu3 }
 0x38a   : > { %v1446_v36 = vadd.f32 %v2720_v2, %v1445_v35  ;;  %v1698_v4 = vpop.permute.xlu2 %1697 }
 0x38c   : > { %v1517_v13 = vsel %vm660_vm7, %v1446_v36, %v2723_v3 }
 0x38d   : > { %1534 = vst.msk [vmem:[%s2730_s21 + $0x30] sm:$0xff] %vm1527_vm0, %v1517_v13 }
 0x38e   : > { %1631 = vst.msk [vmem:[%s2730_s21 + $0x30] sm:$0xff] %vm1624_vm11, %v1589_v28 }
 0x38f   : > { %1728 = vst.msk [vmem:[%s2730_s21 + $0x30] sm:$0xff] %vm1721_vm6, %v1686_v53 }
 0x391   : > { %v1448_v30 = vpop.f32.mrf.mxu3 }
 0x392   : > { %v1449_v32 = vadd.f32 %v2720_v2, %v1448_v30  ;;  %v1603_v41 = vpop.permute.xlu2 %1602 }
 0x394   : > { %v1518_v14 = vsel %vm661_vm5, %v1449_v32, %v2723_v3 }
 0x395   : > { %1535 = vst.msk [vmem:[%s2730_s21 + $0x38] sm:$0xff] %vm1527_vm0, %v1518_v14 }
 0x396   : > { %1632 = vst.msk [vmem:[%s2730_s21 + $0x38] sm:$0xff] %vm1624_vm11, %v1591_v54 }
 0x397   : > { %1729 = vst.msk [vmem:[%s2730_s21 + $0x38] sm:$0xff] %vm1721_vm6, %v1688_v38 }
 0x399   : > { %v1451_v45 = vpop.f32.mrf.mxu3 }
 0x39a   : > { %v1452_v44 = vadd.f32 %v2720_v2, %v1451_v45  ;;  %v1704_v26 = vpop.permute.xlu2 %1703 }
 0x39c   : > { %v1519_v15 = vsel %vm662_vm8, %v1452_v44, %v2723_v3 }
 0x39d   : > { %1536 = vst.msk [vmem:[%s2730_s21 + $0x40] sm:$0xff] %vm1527_vm0, %v1519_v15 }
 0x39e   : > { %1633 = vst.msk [vmem:[%s2730_s21 + $0x40] sm:$0xff] %vm1624_vm11, %v1593_v55 }
 0x39f   : > { %1730 = vst.msk [vmem:[%s2730_s21 + $0x40] sm:$0xff] %vm1721_vm6, %v1690_v57 }
 0x3a1   : > { %v1454_v58 = vpop.f32.mrf.mxu3 }
 0x3a2   : > { %v1455_v39 = vadd.f32 %v2720_v2, %v1454_v58 }
 0x3a4   : > { %v1520_v62 = vsel %vm663_vm9, %v1455_v39, %v2723_v3 }
 0x3a5   : > { %1537 = vst.msk [vmem:[%s2730_s21 + $0x48] sm:$0xff] %vm1527_vm0, %v1520_v62 }
 0x3a6   : > { %1634 = vst.msk [vmem:[%s2730_s21 + $0x48] sm:$0xff] %vm1624_vm11, %v1595_v37 }
 0x3a7   : > { %1731 = vst.msk [vmem:[%s2730_s21 + $0x48] sm:$0xff] %vm1721_vm6, %v1692_v18 }
 0x3a9   : > { %v1457_v61 = vpop.f32.mrf.mxu3 }
 0x3aa   : > { %v1458_v21 = vadd.f32 %v2720_v2, %v1457_v61 }
 0x3ac   : > { %v1521_v60 = vsel %vm664_vm10, %v1458_v21, %v2723_v3 }
 0x3ad   : > { %1538 = vst.msk [vmem:[%s2730_s21 + $0x50] sm:$0xff] %vm1527_vm0, %v1521_v60 }
 0x3ae   : > { %1635 = vst.msk [vmem:[%s2730_s21 + $0x50] sm:$0xff] %vm1624_vm11, %v1597_v5 }
 0x3af   : > { %1732 = vst.msk [vmem:[%s2730_s21 + $0x50] sm:$0xff] %vm1721_vm6, %v1694_v46 }
 0x3b1   : > { %v1460_v63 = vpop.f32.mrf.mxu3 }
 0x3b2   : > { %v1461_v27 = vadd.f32 %v2720_v2, %v1460_v63 }
 0x3b4   : > { %v1522_v42 = vsel %vm2913_vm14, %v1461_v27, %v2723_v3 }
 0x3b5   : > { %1539 = vst.msk [vmem:[%s2730_s21 + $0x58] sm:$0xff] %vm1527_vm0, %v1522_v42 }
 0x3b6   : > { %1636 = vst.msk [vmem:[%s2730_s21 + $0x58] sm:$0xff] %vm1624_vm11, %v1599_v49 }
 0x3b7   : > { %1733 = vst.msk [vmem:[%s2730_s21 + $0x58] sm:$0xff] %vm1721_vm6, %v1696_v24 }
 0x3b9   : > { %v1463_v56 = vpop.f32.mrf.mxu3 }
 0x3ba   : > { %v1464_v20 = vadd.f32 %v2720_v2, %v1463_v56 }
 0x3bc   : > { %v1523_v29 = vsel %vm2914_vm15, %v1464_v20, %v2723_v3 }
 0x3bd   : > { %1540 = vst.msk [vmem:[%s2730_s21 + $0x60] sm:$0xff] %vm1527_vm0, %v1523_v29 }
 0x3be   : > { %1637 = vst.msk [vmem:[%s2730_s21 + $0x60] sm:$0xff] %vm1624_vm11, %v1601_v47 }
 0x3bf   : > { %1734 = vst.msk [vmem:[%s2730_s21 + $0x60] sm:$0xff] %vm1721_vm6, %v1698_v4 }
 0x3c1   : > { %v1466_v52 = vpop.f32.mrf.mxu3 }
 0x3c2   : > { %v1467_v16 = vadd.f32 %v2720_v2, %v1466_v52 }
 0x3c4   : > { %v1524_v10 = vsel %vm667_vm13, %v1467_v16, %v2723_v3 }
 0x3c5   : > { %1541 = vst.msk [vmem:[%s2730_s21 + $0x68] sm:$0xff] %vm1527_vm0, %v1524_v10 }
 0x3c6   : > { %1638 = vst.msk [vmem:[%s2730_s21 + $0x68] sm:$0xff] %vm1624_vm11, %v1603_v41 }
 0x3c7   : > { %1735 = vst.msk [vmem:[%s2730_s21 + $0x68] sm:$0xff] %vm1721_vm6, %v1700_v48 }
 0x3c9   : > { %v1469_v43 = vpop.f32.mrf.mxu3 }
 0x3ca   : > { %v1470_v59 = vadd.f32 %v2720_v2, %v1469_v43 }
 0x3cc   : > { %v1525_v23 = vsel %vm668_vm12, %v1470_v59, %v2723_v3 }
 0x3cd   : > { %1542 = vst.msk [vmem:[%s2730_s21 + $0x70] sm:$0xff] %vm1527_vm0, %v1525_v23 }
 0x3ce   : > { %1639 = vst.msk [vmem:[%s2730_s21 + $0x70] sm:$0xff] %vm1624_vm11, %v1605_v8 }
 0x3cf   : > { %1736 = vst.msk [vmem:[%s2730_s21 + $0x70] sm:$0xff] %vm1721_vm6, %v1702_v34 }
 0x3d1   : > { %v1472_v12 = vpop.f32.mrf.mxu3 }
 0x3d2   : > { %v1473_v51 = vadd.f32 %v2720_v2, %v1472_v12 }
 0x3d4   : > { %v1526_v50 = vsel %vm2915_vm1, %v1473_v51, %v2723_v3 }
 0x3d5   : > { %1543 = vst.msk [vmem:[%s2730_s21 + $0x78] sm:$0xff] %vm1527_vm0, %v1526_v50 }
 0x3d6   : > { %1640 = vst.msk [vmem:[%s2730_s21 + $0x78] sm:$0xff] %vm1624_vm11, %v1607_v9 }
 0x3d7   : > { %1737 = vst.msk [vmem:[%s2730_s21 + $0x78] sm:$0xff] %vm1721_vm6, %v1704_v26 }
 0x3d8 PF: > { %s24_s29 = sadd.s32 1, %s1962_s29  }
 0x3d9   : > { %p21_p5 = scmp.ge.s32.totalorder %s24_s29, 4  }
 0x3db   :  { %23 = sbr.rel (!%p21_p5) target bundleno = 1 (0x1), region = 109 }

</bundles_post_ra>
